<compile_context>
chip_gen: v7x
topology: tpu7x:2x2x1
jax: 0.10.0
libtpu: 0.0.40
codegen_flags: <defaults>
</compile_context>

<pallas_src>
import functools

import jax
import jax.numpy as jnp
import numpy as np
from jax.experimental import pallas as pl
from jax.experimental.pallas import tpu as pltpu  # noqa: F401  (TPU backend / memory spaces)

HIDDEN = 32          # hidden_size
HEADS = 4
EMB = HIDDEN // HEADS
NEG_INF = -1.0e9     # matches the reference masked_fill value

LAYER_KEYS = [
    'attack_style', 'attack_target', 'market_buy', 'inventory_destroy',
    'inventory_give_item', 'inventory_give_player', 'gold_quantity',
    'gold_target', 'move', 'inventory_sell', 'inventory_price', 'inventory_use',
]
LAYER_DIMS = {
    'attack_style': 3, 'attack_target': HIDDEN, 'market_buy': HIDDEN,
    'inventory_destroy': HIDDEN, 'inventory_give_item': HIDDEN,
    'inventory_give_player': HIDDEN, 'gold_quantity': 99, 'gold_target': HIDDEN,
    'move': 5, 'inventory_sell': HIDDEN, 'inventory_price': 99,
    'inventory_use': HIDDEN,
}
EMB_SOURCE = {
    'attack_target': 'player', 'market_buy': 'market',
    'inventory_destroy': 'inventory', 'inventory_give_item': 'inventory',
    'inventory_give_player': 'player', 'gold_target': 'player',
    'inventory_sell': 'inventory', 'inventory_use': 'inventory',
}

# Packed layout: non-embedding heads first (contiguous, shared offsets with the output),
# then embedding heads grouped by source.
NON_EMB_KEYS = ('attack_style', 'gold_quantity', 'move', 'inventory_price')
PLAYER_KEYS = ('attack_target', 'inventory_give_player', 'gold_target')
INV_KEYS = ('inventory_destroy', 'inventory_give_item', 'inventory_sell', 'inventory_use')
MARKET_KEYS = ('market_buy',)
LAYOUT_KEYS = NON_EMB_KEYS + PLAYER_KEYS + INV_KEYS + MARKET_KEYS


def _round_up(x, m):
    return ((x + m - 1) // m) * m


NE = sum(LAYER_DIMS[k] for k in NON_EMB_KEYS)        # 206 lanes of non-embedding logits
EMB_BLOCK = _round_up(NE, 128)                       # embedding-head weight columns start at 256
N_EMB_KEYS = len(PLAYER_KEYS) + len(INV_KEYS) + len(MARKET_KEYS)
PW = EMB_BLOCK + N_EMB_KEYS * HIDDEN                 # 512: packed action-head weight width


def _softmax_last(s):
    m = jnp.max(s, axis=-1, keepdims=True)
    p = jnp.exp(s - m)
    return p / jnp.sum(p, axis=-1, keepdims=True)


# --------------------------------------------------------------------------------------
# One-time parameter packing (hoisted out of the per-call path)
# --------------------------------------------------------------------------------------
def prepare_decoder_params(params):
    H = HIDDEN
    scale = 1.0 / (EMB ** 0.25)                      # fold q/k scaling into the weights
    wq, wk, wv = params['attn_q'], params['attn_k'], params['attn_v']
    fc_w, fc_b = params['fc']                        # fc_w: [H, 2H], fc_b: [H]

    # [H, 4H] = Wq^T*s | Wk^T*s | Wv^T | fc_w1^T  -> one 128-lane projection per source
    w_qkvb = jnp.concatenate(
        [wq.T * scale, wk.T * scale, wv.T, fc_w[:, :H].T], axis=1)
    fcw2_t = fc_w[:, H:].T                           # [H, H], acts on the attention half

    w_cols, b_cols = [], []

    def add(keys):
        for k in keys:
            w, b = params['layers'][k]               # w: [d, H], b: [d]
            w_cols.append(w.T)
            b_cols.append(b)

    add(NON_EMB_KEYS)
    pad = EMB_BLOCK - NE
    if pad:
        w_cols.append(jnp.zeros((H, pad), jnp.float32))
        b_cols.append(jnp.zeros((pad,), jnp.float32))
    add(PLAYER_KEYS)
    add(INV_KEYS)
    add(MARKET_KEYS)
    w_all_t = jnp.concatenate(w_cols, axis=1)        # [H, PW]
    b_all = jnp.concatenate(b_cols)                  # [PW]

    W = jnp.concatenate([w_qkvb, fcw2_t, w_all_t], axis=1)            # [H, 5H + PW] = [32, 672]
    biases = jnp.concatenate([fc_b, b_all]).reshape(1, H + PW)        # [1, 544]
    return {'W': W, 'biases': biases}


# --------------------------------------------------------------------------------------
# Fused ActionDecoder forward kernel (single invocation, single dense output store)
# --------------------------------------------------------------------------------------
def _decoder_kernel(hid_ref, pe_ref, ie_ref, me_ref, mask_ref, w_ref, b_ref, out_ref,
                    *, B, Tp, Ti, Tm, wp, wi, wm, PO):
    H, E = HIDDEN, EMB
    f32 = jnp.float32

    W = w_ref[...]                                   # [H, 5H + PW]
    w_qkvb = W[:, :4 * H]                            # Wq^T*s | Wk^T*s | Wv^T | fc_w1^T
    fcw2_t = W[:, 4 * H:5 * H]                       # [H, H]
    w_all_t = W[:, 5 * H:]                           # [H, PW]
    fcb = b_ref[:, :H]                               # [1, H]
    b_all = b_ref[:, H:]                             # [1, PW]

    def attend(x3, T):
        """relu(fc(cat(x, selfattn(x)))) for B sequences of length T, batched over B."""
        x2 = x3.reshape(B * T, H)
        qkvb = jnp.dot(x2, w_qkvb, preferred_element_type=f32)         # [B*T, 4H]
        acc = qkvb[:, 3 * H:] + fcb                                    # fc first half + bias
        q3 = qkvb[:, 0 * H:1 * H].reshape(B, T, H)
        k3 = qkvb[:, 1 * H:2 * H].reshape(B, T, H)
        v3 = qkvb[:, 2 * H:3 * H].reshape(B, T, H)
        for h in range(HEADS):                                         # static 4-way unroll
            sl = slice(h * E, (h + 1) * E)
            s = jnp.einsum('bte,bse->bts', q3[..., sl], k3[..., sl],
                           preferred_element_type=f32)                 # [B, T, T]
            p = _softmax_last(s)
            o = jnp.einsum('bts,bse->bte', p, v3[..., sl],
                           preferred_element_type=f32)                 # [B, T, E]
            acc = acc + jnp.dot(o.reshape(B * T, E), fcw2_t[sl, :],
                                preferred_element_type=f32)            # += o @ fc_w2_h^T
        return jnp.maximum(acc, 0.0).reshape(B, T, H)

    player = attend(pe_ref[...], Tp)                                   # [B, Tp, H]
    inventory = attend(ie_ref[...], Ti)                                # [B, Ti, H]

    # hidden is a length-1 sequence: softmax over 1 element == 1, so attention output == V.
    hq = jnp.dot(hid_ref[...], w_qkvb, preferred_element_type=f32)     # [B, 4H]
    h_acc = hq[:, 3 * H:] + fcb + jnp.dot(hq[:, 2 * H:3 * H], fcw2_t,
                                          preferred_element_type=f32)
    h_proc = jnp.maximum(h_acc, 0.0)                                   # [B, H]

    # All 12 action-head projections with ONE lane-dense matmul (bias folded in).
    hp = jnp.dot(h_proc, w_all_t, preferred_element_type=f32) + b_all  # [B, PW]

    def pad_targets(proc, T, width):
        # Extra "no-op" slot == zero embedding row of the reference -> exact 0 logit pre-mask.
        if width == T + 1:
            return jnp.concatenate([proc, jnp.zeros((B, 1, H), f32)], axis=1)
        return proc

    player_t = pad_targets(player, Tp, wp)                             # [B, wp, H]
    inv_t = pad_targets(inventory, Ti, wi)                             # [B, wi, H]
    market_t = pad_targets(me_ref[...], Tm, wm)                        # [B, wm, H]

    def key_scores(off, targets):
        hpj = hp[:, off:off + H].reshape(B, 1, H)
        sc = jnp.einsum('bkh,bth->bkt', hpj, targets,
                        preferred_element_type=f32)                    # [B, 1, width]
        return sc[:, 0, :]                                             # [B, width]

    p_off = EMB_BLOCK
    i_off = p_off + len(PLAYER_KEYS) * H
    m_off = i_off + len(INV_KEYS) * H

    segs = [hp[:, :NE]]                                                # non-embedding heads (206)
    for j in range(len(PLAYER_KEYS)):
        segs.append(key_scores(p_off + j * H, player_t))
    for j in range(len(INV_KEYS)):
        segs.append(key_scores(i_off + j * H, inv_t))
    segs.append(key_scores(m_off, market_t))

    used = NE + len(PLAYER_KEYS) * wp + len(INV_KEYS) * wi + wm
    if PO > used:
        segs.append(jnp.zeros((B, PO - used), f32))

    out_val = jnp.concatenate(segs, axis=-1)                           # [B, PO] value
    out_ref[...] = jnp.where(mask_ref[...] == 0, NEG_INF, out_val)     # ONE dense masked store


# --------------------------------------------------------------------------------------
# Per-call wrapper: only the runtime masks are concatenated here; weights come pre-packed.
# --------------------------------------------------------------------------------------
def action_decoder_forward(prepared, hidden, player_emb, inv_emb, market_emb, masks):
    B, Tp, H = player_emb.shape
    Ti = inv_emb.shape[1]
    Tm = market_emb.shape[1]
    assert H == HIDDEN

    def group_width(keys, T):
        widths = {masks[k].shape[1] for k in keys}
        assert len(widths) == 1, f'mask widths differ within group {keys}'
        w = widths.pop()
        assert w in (T, T + 1), f'unsupported mask width {w} for source length {T}'
        return w

    wp = group_width(PLAYER_KEYS, Tp)
    wi = group_width(INV_KEYS, Ti)
    wm = group_width(MARKET_KEYS, Tm)
    for k in NON_EMB_KEYS:
        assert masks[k].shape[1] == LAYER_DIMS[k]

    # Flat mask layout (== flat output layout), padded to a lane-dense width.
    out_off, out_dim, off = {}, {}, 0
    for k in LAYOUT_KEYS:
        d = masks[k].shape[1]
        out_off[k] = off
        out_dim[k] = d
        off += d
    total = off
    PO = _round_up(total, 128)
    mask_parts = [masks[k].astype(jnp.int32) for k in LAYOUT_KEYS]
    if PO > total:
        mask_parts.append(jnp.zeros((B, PO - total), jnp.int32))
    mask_flat = jnp.concatenate(mask_parts, axis=1)                    # [B, PO]

    kernel = functools.partial(_decoder_kernel, B=B, Tp=Tp, Ti=Ti, Tm=Tm,
                               wp=wp, wi=wi, wm=wm, PO=PO)

    # No grid: one invocation, every operand resident whole in VMEM, no pipeline bookkeeping.
    out_flat = pl.pallas_call(
        kernel,
        out_shape=jax.ShapeDtypeStruct((B, PO), jnp.float32),
    )(hidden, player_emb, inv_emb, market_emb, mask_flat,
      prepared['W'], prepared['biases'])

    return [out_flat[:, out_off[k]:out_off[k] + out_dim[k]] for k in LAYER_KEYS]


# --------------------------------------------------------------------------------------
# Pure-JAX reference (mirrors the PyTorch forward exactly), used to validate the kernel
# --------------------------------------------------------------------------------------
def _ref_attn(x, wq, wk, wv):
    b, t, _ = x.shape
    q = (x @ wq.T).reshape(b, t, HEADS, EMB).transpose(0, 2, 1, 3) / EMB ** 0.25
    k = (x @ wk.T).reshape(b, t, HEADS, EMB).transpose(0, 2, 1, 3) / EMB ** 0.25
    v = (x @ wv.T).reshape(b, t, HEADS, EMB).transpose(0, 2, 1, 3)
    dot = jnp.einsum('bhte,bhse->bhts', q, k)
    dot = _softmax_last(dot)
    out = jnp.einsum('bhts,bhse->bhte', dot, v)
    return out.transpose(0, 2, 1, 3).reshape(b, t, HEADS * EMB)


def ref_forward(params, hidden, player_emb, inv_emb, market_emb, masks):
    B, Tp, H = player_emb.shape
    wq, wk, wv = params['attn_q'], params['attn_k'], params['attn_v']
    fc_w, fc_b = params['fc']

    pe_att = _ref_attn(player_emb, wq, wk, wv)
    ie_att = _ref_attn(inv_emb, wq, wk, wv)
    h_att = _ref_attn(hidden[:, None, :], wq, wk, wv)[:, 0, :]

    player = jnp.maximum(jnp.concatenate([player_emb, pe_att], -1) @ fc_w.T + fc_b, 0.0)
    inventory = jnp.maximum(jnp.concatenate([inv_emb, ie_att], -1) @ fc_w.T + fc_b, 0.0)
    h = jnp.maximum(jnp.concatenate([hidden, h_att], -1) @ fc_w.T + fc_b, 0.0)

    emb_map = {'player': player, 'inventory': inventory, 'market': market_emb}
    actions = []
    for key in LAYER_KEYS:
        w, b = params['layers'][key]
        mask = masks[key]
        src = EMB_SOURCE.get(key)
        out = h @ w.T + b
        if src is not None:
            embs = emb_map[src]
            if embs.shape[1] != mask.shape[1]:
                embs = jnp.concatenate([embs, jnp.zeros((B, 1, H), embs.dtype)], axis=1)
            out = jnp.einsum('bth,bh->bt', embs, out)
        out = jnp.where(mask == 0, NEG_INF, out)
        actions.append(out)
    return actions


# --------------------------------------------------------------------------------------
def init_linear(key, out_f, in_f, bias=True):
    kw, kb = jax.random.split(key)
    bound = 1.0 / (in_f ** 0.5)
    w = jax.random.uniform(kw, (out_f, in_f), jnp.float32, -bound, bound)
    if not bias:
        return (w,)
    b = jax.random.uniform(kb, (out_f,), jnp.float32, -bound, bound)
    return w, b


if __name__ == "__main__":
    key = jax.random.PRNGKey(0)
    B, Tp, Ti, Tm = 2, 8, 8, 8
    keys = jax.random.split(key, 8)

    hidden = jax.random.normal(keys[0], (B, HIDDEN), jnp.float32)
    player_emb = jax.random.normal(keys[1], (B, Tp, HIDDEN), jnp.float32)
    inv_emb = jax.random.normal(keys[2], (B, Ti, HIDDEN), jnp.float32)
    market_emb = jax.random.normal(keys[3], (B, Tm, HIDDEN), jnp.float32)

    pkeys = jax.random.split(keys[4], 4 + len(LAYER_KEYS))
    params = {
        'attn_q': init_linear(pkeys[0], HIDDEN, HIDDEN, bias=False)[0],
        'attn_k': init_linear(pkeys[1], HIDDEN, HIDDEN, bias=False)[0],
        'attn_v': init_linear(pkeys[2], HIDDEN, HIDDEN, bias=False)[0],
        'fc': init_linear(pkeys[3], HIDDEN, 2 * HIDDEN),
        'layers': {k: init_linear(pkeys[4 + i], LAYER_DIMS[k], HIDDEN)
                   for i, k in enumerate(LAYER_KEYS)},
    }

    # action_targets masks (int32 0/1); some embedding targets have an extra "no-op" slot
    # so the zero-row padding path of the original forward is exercised.
    mask_shapes = {
        'attack_style': 3, 'attack_target': Tp + 1, 'market_buy': Tm,
        'inventory_destroy': Ti + 1, 'inventory_give_item': Ti + 1,
        'inventory_give_player': Tp + 1, 'gold_quantity': 99,
        'gold_target': Tp + 1, 'move': 5, 'inventory_sell': Ti + 1,
        'inventory_price': 99, 'inventory_use': Ti + 1,
    }
    mkeys = jax.random.split(keys[5], len(LAYER_KEYS))
    masks = {k: jax.random.bernoulli(mkeys[i], 0.7, (B, mask_shapes[k])).astype(jnp.int32)
             for i, k in enumerate(LAYER_KEYS)}

    prepared = prepare_decoder_params(params)       # one-time weight packing
    actions = action_decoder_forward(prepared, hidden, player_emb, inv_emb, market_emb, masks)
    actions = jax.block_until_ready(actions)

    refs = ref_forward(params, hidden, player_emb, inv_emb, market_emb, masks)
    for key_name, a, r in zip(LAYER_KEYS, actions, refs):
        assert a.shape == r.shape, (key_name, a.shape, r.shape)
        np.testing.assert_allclose(np.asarray(a), np.asarray(r), rtol=2e-3, atol=2e-3)

    print("KERNEL_OK")
</pallas_src>

<mosaic_0001>
module attributes {stable_mosaic.version = 11 : i64} {
  func.func @_decoder_kernel(%arg0: memref<2x32xf32, #tpu.memory_space<vmem>>, %arg1: memref<2x8x32xf32, #tpu.memory_space<vmem>>, %arg2: memref<2x8x32xf32, #tpu.memory_space<vmem>>, %arg3: memref<2x8x32xf32, #tpu.memory_space<vmem>>, %arg4: memref<2x384xi32, #tpu.memory_space<vmem>>, %arg5: memref<32x672xf32, #tpu.memory_space<vmem>>, %arg6: memref<1x544xf32, #tpu.memory_space<vmem>>, %arg7: memref<2x384xf32, #tpu.memory_space<vmem>>) attributes {dimension_semantics = [], scalar_prefetch = 0 : i64, scratch_operands = 0 : i64, tpu.core_type = #tpu.core_type<tc>} {
    %c0 = arith.constant 0 : index
    %c0_0 = arith.constant 0 : index
    %0 = vector.load %arg5[%c0, %c0_0] : memref<32x672xf32, #tpu.memory_space<vmem>>, vector<32x672xf32>
    %1 = vector.extract_strided_slice %0 {offsets = [0, 0], sizes = [32, 128], strides = [1, 1]} : vector<32x672xf32> to vector<32x128xf32>
    %2 = vector.extract_strided_slice %0 {offsets = [0, 128], sizes = [32, 32], strides = [1, 1]} : vector<32x672xf32> to vector<32x32xf32>
    %3 = vector.extract_strided_slice %0 {offsets = [0, 160], sizes = [32, 512], strides = [1, 1]} : vector<32x672xf32> to vector<32x512xf32>
    %c0_1 = arith.constant 0 : index
    %c0_2 = arith.constant 0 : index
    %4 = vector.load %arg6[%c0_1, %c0_2] : memref<1x544xf32, #tpu.memory_space<vmem>>, vector<1x32xf32>
    %c0_3 = arith.constant 0 : index
    %c32 = arith.constant 32 : index
    %5 = vector.load %arg6[%c0_3, %c32] : memref<1x544xf32, #tpu.memory_space<vmem>>, vector<1x512xf32>
    %c0_4 = arith.constant 0 : index
    %c0_5 = arith.constant 0 : index
    %c0_6 = arith.constant 0 : index
    %6 = vector.load %arg1[%c0_4, %c0_5, %c0_6] : memref<2x8x32xf32, #tpu.memory_space<vmem>>, vector<2x8x32xf32>
    %7 = vector.shape_cast %6 : vector<2x8x32xf32> to vector<16x32xf32>
    %cst = arith.constant dense<0.000000e+00> : vector<16x128xf32>
    %8 = tpu.matmul %7, %1, %cst {dimension_numbers = #tpu.dot_dimension_numbers<[1], [0], [0], [1], [0, 0, 1, 1], [], []>} : vector<16x32xf32>, vector<32x128xf32>, vector<16x128xf32> -> vector<16x128xf32>
    %9 = vector.extract_strided_slice %8 {offsets = [0, 96], sizes = [16, 32], strides = [1, 1]} : vector<16x128xf32> to vector<16x32xf32>
    %10 = vector.broadcast %4 : vector<1x32xf32> to vector<16x32xf32>
    %11 = arith.addf %9, %10 : vector<16x32xf32>
    %12 = vector.extract_strided_slice %8 {offsets = [0, 0], sizes = [16, 32], strides = [1, 1]} : vector<16x128xf32> to vector<16x32xf32>
    %13 = vector.shape_cast %12 : vector<16x32xf32> to vector<2x8x32xf32>
    %14 = vector.extract_strided_slice %8 {offsets = [0, 32], sizes = [16, 32], strides = [1, 1]} : vector<16x128xf32> to vector<16x32xf32>
    %15 = vector.shape_cast %14 : vector<16x32xf32> to vector<2x8x32xf32>
    %16 = vector.extract_strided_slice %8 {offsets = [0, 64], sizes = [16, 32], strides = [1, 1]} : vector<16x128xf32> to vector<16x32xf32>
    %17 = vector.shape_cast %16 : vector<16x32xf32> to vector<2x8x32xf32>
    %18 = vector.extract_strided_slice %13 {offsets = [0, 0, 0], sizes = [2, 8, 8], strides = [1, 1, 1]} : vector<2x8x32xf32> to vector<2x8x8xf32>
    %19 = vector.extract_strided_slice %15 {offsets = [0, 0, 0], sizes = [2, 8, 8], strides = [1, 1, 1]} : vector<2x8x32xf32> to vector<2x8x8xf32>
    "tpu.trace_start"() <{level = 10 : i32, message = "bte,bse->bts"}> : () -> ()
    %cst_7 = arith.constant dense<0.000000e+00> : vector<2x8x8xf32>
    %20 = tpu.matmul %18, %19, %cst_7 {dimension_numbers = #tpu.dot_dimension_numbers<[2], [2], [1], [1], [0, 0, 0, 1, 1, 1], [0], [0]>} : vector<2x8x8xf32>, vector<2x8x8xf32>, vector<2x8x8xf32> -> vector<2x8x8xf32>
    "tpu.trace_stop"() : () -> ()
    %cst_8 = arith.constant dense<0xFF800000> : vector<2x8xf32>
    %21 = vector.multi_reduction <maximumf>, %20, %cst_8 [2] : vector<2x8x8xf32> to vector<2x8xf32>
    %22 = vector.shape_cast %21 : vector<2x8xf32> to vector<2x8x1xf32>
    %23 = vector.broadcast %22 : vector<2x8x1xf32> to vector<2x8x8xf32>
    %24 = arith.subf %20, %23 : vector<2x8x8xf32>
    %25 = math.exp %24 : vector<2x8x8xf32>
    %cst_9 = arith.constant dense<0.000000e+00> : vector<2x8xf32>
    %26 = vector.multi_reduction <add>, %25, %cst_9 [2] : vector<2x8x8xf32> to vector<2x8xf32>
    %27 = vector.shape_cast %26 : vector<2x8xf32> to vector<2x8x1xf32>
    %28 = vector.broadcast %27 : vector<2x8x1xf32> to vector<2x8x8xf32>
    %29 = arith.divf %25, %28 : vector<2x8x8xf32>
    %30 = vector.extract_strided_slice %17 {offsets = [0, 0, 0], sizes = [2, 8, 8], strides = [1, 1, 1]} : vector<2x8x32xf32> to vector<2x8x8xf32>
    "tpu.trace_start"() <{level = 10 : i32, message = "bts,bse->bte"}> : () -> ()
    %cst_10 = arith.constant dense<0.000000e+00> : vector<2x8x8xf32>
    %31 = tpu.matmul %29, %30, %cst_10 {dimension_numbers = #tpu.dot_dimension_numbers<[2], [1], [1], [2], [0, 0, 0, 1, 1, 2], [0], [0]>} : vector<2x8x8xf32>, vector<2x8x8xf32>, vector<2x8x8xf32> -> vector<2x8x8xf32>
    "tpu.trace_stop"() : () -> ()
    %32 = vector.shape_cast %31 : vector<2x8x8xf32> to vector<16x8xf32>
    %33 = vector.extract_strided_slice %2 {offsets = [0, 0], sizes = [8, 32], strides = [1, 1]} : vector<32x32xf32> to vector<8x32xf32>
    %cst_11 = arith.constant dense<0.000000e+00> : vector<16x32xf32>
    %34 = tpu.matmul %32, %33, %cst_11 {dimension_numbers = #tpu.dot_dimension_numbers<[1], [0], [0], [1], [0, 0, 1, 1], [], []>} : vector<16x8xf32>, vector<8x32xf32>, vector<16x32xf32> -> vector<16x32xf32>
    %35 = arith.addf %11, %34 : vector<16x32xf32>
    %36 = vector.extract_strided_slice %13 {offsets = [0, 0, 8], sizes = [2, 8, 8], strides = [1, 1, 1]} : vector<2x8x32xf32> to vector<2x8x8xf32>
    %37 = vector.extract_strided_slice %15 {offsets = [0, 0, 8], sizes = [2, 8, 8], strides = [1, 1, 1]} : vector<2x8x32xf32> to vector<2x8x8xf32>
    "tpu.trace_start"() <{level = 10 : i32, message = "bte,bse->bts"}> : () -> ()
    %cst_12 = arith.constant dense<0.000000e+00> : vector<2x8x8xf32>
    %38 = tpu.matmul %36, %37, %cst_12 {dimension_numbers = #tpu.dot_dimension_numbers<[2], [2], [1], [1], [0, 0, 0, 1, 1, 1], [0], [0]>} : vector<2x8x8xf32>, vector<2x8x8xf32>, vector<2x8x8xf32> -> vector<2x8x8xf32>
    "tpu.trace_stop"() : () -> ()
    %cst_13 = arith.constant dense<0xFF800000> : vector<2x8xf32>
    %39 = vector.multi_reduction <maximumf>, %38, %cst_13 [2] : vector<2x8x8xf32> to vector<2x8xf32>
    %40 = vector.shape_cast %39 : vector<2x8xf32> to vector<2x8x1xf32>
    %41 = vector.broadcast %40 : vector<2x8x1xf32> to vector<2x8x8xf32>
    %42 = arith.subf %38, %41 : vector<2x8x8xf32>
    %43 = math.exp %42 : vector<2x8x8xf32>
    %cst_14 = arith.constant dense<0.000000e+00> : vector<2x8xf32>
    %44 = vector.multi_reduction <add>, %43, %cst_14 [2] : vector<2x8x8xf32> to vector<2x8xf32>
    %45 = vector.shape_cast %44 : vector<2x8xf32> to vector<2x8x1xf32>
    %46 = vector.broadcast %45 : vector<2x8x1xf32> to vector<2x8x8xf32>
    %47 = arith.divf %43, %46 : vector<2x8x8xf32>
    %48 = vector.extract_strided_slice %17 {offsets = [0, 0, 8], sizes = [2, 8, 8], strides = [1, 1, 1]} : vector<2x8x32xf32> to vector<2x8x8xf32>
    "tpu.trace_start"() <{level = 10 : i32, message = "bts,bse->bte"}> : () -> ()
    %cst_15 = arith.constant dense<0.000000e+00> : vector<2x8x8xf32>
    %49 = tpu.matmul %47, %48, %cst_15 {dimension_numbers = #tpu.dot_dimension_numbers<[2], [1], [1], [2], [0, 0, 0, 1, 1, 2], [0], [0]>} : vector<2x8x8xf32>, vector<2x8x8xf32>, vector<2x8x8xf32> -> vector<2x8x8xf32>
    "tpu.trace_stop"() : () -> ()
    %50 = vector.shape_cast %49 : vector<2x8x8xf32> to vector<16x8xf32>
    %51 = vector.extract_strided_slice %2 {offsets = [8, 0], sizes = [8, 32], strides = [1, 1]} : vector<32x32xf32> to vector<8x32xf32>
    %cst_16 = arith.constant dense<0.000000e+00> : vector<16x32xf32>
    %52 = tpu.matmul %50, %51, %cst_16 {dimension_numbers = #tpu.dot_dimension_numbers<[1], [0], [0], [1], [0, 0, 1, 1], [], []>} : vector<16x8xf32>, vector<8x32xf32>, vector<16x32xf32> -> vector<16x32xf32>
    %53 = arith.addf %35, %52 : vector<16x32xf32>
    %54 = vector.extract_strided_slice %13 {offsets = [0, 0, 16], sizes = [2, 8, 8], strides = [1, 1, 1]} : vector<2x8x32xf32> to vector<2x8x8xf32>
    %55 = vector.extract_strided_slice %15 {offsets = [0, 0, 16], sizes = [2, 8, 8], strides = [1, 1, 1]} : vector<2x8x32xf32> to vector<2x8x8xf32>
    "tpu.trace_start"() <{level = 10 : i32, message = "bte,bse->bts"}> : () -> ()
    %cst_17 = arith.constant dense<0.000000e+00> : vector<2x8x8xf32>
    %56 = tpu.matmul %54, %55, %cst_17 {dimension_numbers = #tpu.dot_dimension_numbers<[2], [2], [1], [1], [0, 0, 0, 1, 1, 1], [0], [0]>} : vector<2x8x8xf32>, vector<2x8x8xf32>, vector<2x8x8xf32> -> vector<2x8x8xf32>
    "tpu.trace_stop"() : () -> ()
    %cst_18 = arith.constant dense<0xFF800000> : vector<2x8xf32>
    %57 = vector.multi_reduction <maximumf>, %56, %cst_18 [2] : vector<2x8x8xf32> to vector<2x8xf32>
    %58 = vector.shape_cast %57 : vector<2x8xf32> to vector<2x8x1xf32>
    %59 = vector.broadcast %58 : vector<2x8x1xf32> to vector<2x8x8xf32>
    %60 = arith.subf %56, %59 : vector<2x8x8xf32>
    %61 = math.exp %60 : vector<2x8x8xf32>
    %cst_19 = arith.constant dense<0.000000e+00> : vector<2x8xf32>
    %62 = vector.multi_reduction <add>, %61, %cst_19 [2] : vector<2x8x8xf32> to vector<2x8xf32>
    %63 = vector.shape_cast %62 : vector<2x8xf32> to vector<2x8x1xf32>
    %64 = vector.broadcast %63 : vector<2x8x1xf32> to vector<2x8x8xf32>
    %65 = arith.divf %61, %64 : vector<2x8x8xf32>
    %66 = vector.extract_strided_slice %17 {offsets = [0, 0, 16], sizes = [2, 8, 8], strides = [1, 1, 1]} : vector<2x8x32xf32> to vector<2x8x8xf32>
    "tpu.trace_start"() <{level = 10 : i32, message = "bts,bse->bte"}> : () -> ()
    %cst_20 = arith.constant dense<0.000000e+00> : vector<2x8x8xf32>
    %67 = tpu.matmul %65, %66, %cst_20 {dimension_numbers = #tpu.dot_dimension_numbers<[2], [1], [1], [2], [0, 0, 0, 1, 1, 2], [0], [0]>} : vector<2x8x8xf32>, vector<2x8x8xf32>, vector<2x8x8xf32> -> vector<2x8x8xf32>
    "tpu.trace_stop"() : () -> ()
    %68 = vector.shape_cast %67 : vector<2x8x8xf32> to vector<16x8xf32>
    %69 = vector.extract_strided_slice %2 {offsets = [16, 0], sizes = [8, 32], strides = [1, 1]} : vector<32x32xf32> to vector<8x32xf32>
    %cst_21 = arith.constant dense<0.000000e+00> : vector<16x32xf32>
    %70 = tpu.matmul %68, %69, %cst_21 {dimension_numbers = #tpu.dot_dimension_numbers<[1], [0], [0], [1], [0, 0, 1, 1], [], []>} : vector<16x8xf32>, vector<8x32xf32>, vector<16x32xf32> -> vector<16x32xf32>
    %71 = arith.addf %53, %70 : vector<16x32xf32>
    %72 = vector.extract_strided_slice %13 {offsets = [0, 0, 24], sizes = [2, 8, 8], strides = [1, 1, 1]} : vector<2x8x32xf32> to vector<2x8x8xf32>
    %73 = vector.extract_strided_slice %15 {offsets = [0, 0, 24], sizes = [2, 8, 8], strides = [1, 1, 1]} : vector<2x8x32xf32> to vector<2x8x8xf32>
    "tpu.trace_start"() <{level = 10 : i32, message = "bte,bse->bts"}> : () -> ()
    %cst_22 = arith.constant dense<0.000000e+00> : vector<2x8x8xf32>
    %74 = tpu.matmul %72, %73, %cst_22 {dimension_numbers = #tpu.dot_dimension_numbers<[2], [2], [1], [1], [0, 0, 0, 1, 1, 1], [0], [0]>} : vector<2x8x8xf32>, vector<2x8x8xf32>, vector<2x8x8xf32> -> vector<2x8x8xf32>
    "tpu.trace_stop"() : () -> ()
    %cst_23 = arith.constant dense<0xFF800000> : vector<2x8xf32>
    %75 = vector.multi_reduction <maximumf>, %74, %cst_23 [2] : vector<2x8x8xf32> to vector<2x8xf32>
    %76 = vector.shape_cast %75 : vector<2x8xf32> to vector<2x8x1xf32>
    %77 = vector.broadcast %76 : vector<2x8x1xf32> to vector<2x8x8xf32>
    %78 = arith.subf %74, %77 : vector<2x8x8xf32>
    %79 = math.exp %78 : vector<2x8x8xf32>
    %cst_24 = arith.constant dense<0.000000e+00> : vector<2x8xf32>
    %80 = vector.multi_reduction <add>, %79, %cst_24 [2] : vector<2x8x8xf32> to vector<2x8xf32>
    %81 = vector.shape_cast %80 : vector<2x8xf32> to vector<2x8x1xf32>
    %82 = vector.broadcast %81 : vector<2x8x1xf32> to vector<2x8x8xf32>
    %83 = arith.divf %79, %82 : vector<2x8x8xf32>
    %84 = vector.extract_strided_slice %17 {offsets = [0, 0, 24], sizes = [2, 8, 8], strides = [1, 1, 1]} : vector<2x8x32xf32> to vector<2x8x8xf32>
    "tpu.trace_start"() <{level = 10 : i32, message = "bts,bse->bte"}> : () -> ()
    %cst_25 = arith.constant dense<0.000000e+00> : vector<2x8x8xf32>
    %85 = tpu.matmul %83, %84, %cst_25 {dimension_numbers = #tpu.dot_dimension_numbers<[2], [1], [1], [2], [0, 0, 0, 1, 1, 2], [0], [0]>} : vector<2x8x8xf32>, vector<2x8x8xf32>, vector<2x8x8xf32> -> vector<2x8x8xf32>
    "tpu.trace_stop"() : () -> ()
    %86 = vector.shape_cast %85 : vector<2x8x8xf32> to vector<16x8xf32>
    %87 = vector.extract_strided_slice %2 {offsets = [24, 0], sizes = [8, 32], strides = [1, 1]} : vector<32x32xf32> to vector<8x32xf32>
    %cst_26 = arith.constant dense<0.000000e+00> : vector<16x32xf32>
    %88 = tpu.matmul %86, %87, %cst_26 {dimension_numbers = #tpu.dot_dimension_numbers<[1], [0], [0], [1], [0, 0, 1, 1], [], []>} : vector<16x8xf32>, vector<8x32xf32>, vector<16x32xf32> -> vector<16x32xf32>
    %89 = arith.addf %71, %88 : vector<16x32xf32>
    %cst_27 = arith.constant 0.000000e+00 : f32
    %90 = vector.broadcast %cst_27 : f32 to vector<16x32xf32>
    %91 = arith.maximumf %89, %90 : vector<16x32xf32>
    %92 = vector.shape_cast %91 : vector<16x32xf32> to vector<2x8x32xf32>
    %c0_28 = arith.constant 0 : index
    %c0_29 = arith.constant 0 : index
    %c0_30 = arith.constant 0 : index
    %93 = vector.load %arg2[%c0_28, %c0_29, %c0_30] : memref<2x8x32xf32, #tpu.memory_space<vmem>>, vector<2x8x32xf32>
    %94 = vector.shape_cast %93 : vector<2x8x32xf32> to vector<16x32xf32>
    %cst_31 = arith.constant dense<0.000000e+00> : vector<16x128xf32>
    %95 = tpu.matmul %94, %1, %cst_31 {dimension_numbers = #tpu.dot_dimension_numbers<[1], [0], [0], [1], [0, 0, 1, 1], [], []>} : vector<16x32xf32>, vector<32x128xf32>, vector<16x128xf32> -> vector<16x128xf32>
    %96 = vector.extract_strided_slice %95 {offsets = [0, 96], sizes = [16, 32], strides = [1, 1]} : vector<16x128xf32> to vector<16x32xf32>
    %97 = vector.broadcast %4 : vector<1x32xf32> to vector<16x32xf32>
    %98 = arith.addf %96, %97 : vector<16x32xf32>
    %99 = vector.extract_strided_slice %95 {offsets = [0, 0], sizes = [16, 32], strides = [1, 1]} : vector<16x128xf32> to vector<16x32xf32>
    %100 = vector.shape_cast %99 : vector<16x32xf32> to vector<2x8x32xf32>
    %101 = vector.extract_strided_slice %95 {offsets = [0, 32], sizes = [16, 32], strides = [1, 1]} : vector<16x128xf32> to vector<16x32xf32>
    %102 = vector.shape_cast %101 : vector<16x32xf32> to vector<2x8x32xf32>
    %103 = vector.extract_strided_slice %95 {offsets = [0, 64], sizes = [16, 32], strides = [1, 1]} : vector<16x128xf32> to vector<16x32xf32>
    %104 = vector.shape_cast %103 : vector<16x32xf32> to vector<2x8x32xf32>
    %105 = vector.extract_strided_slice %100 {offsets = [0, 0, 0], sizes = [2, 8, 8], strides = [1, 1, 1]} : vector<2x8x32xf32> to vector<2x8x8xf32>
    %106 = vector.extract_strided_slice %102 {offsets = [0, 0, 0], sizes = [2, 8, 8], strides = [1, 1, 1]} : vector<2x8x32xf32> to vector<2x8x8xf32>
    "tpu.trace_start"() <{level = 10 : i32, message = "bte,bse->bts"}> : () -> ()
    %cst_32 = arith.constant dense<0.000000e+00> : vector<2x8x8xf32>
    %107 = tpu.matmul %105, %106, %cst_32 {dimension_numbers = #tpu.dot_dimension_numbers<[2], [2], [1], [1], [0, 0, 0, 1, 1, 1], [0], [0]>} : vector<2x8x8xf32>, vector<2x8x8xf32>, vector<2x8x8xf32> -> vector<2x8x8xf32>
    "tpu.trace_stop"() : () -> ()
    %cst_33 = arith.constant dense<0xFF800000> : vector<2x8xf32>
    %108 = vector.multi_reduction <maximumf>, %107, %cst_33 [2] : vector<2x8x8xf32> to vector<2x8xf32>
    %109 = vector.shape_cast %108 : vector<2x8xf32> to vector<2x8x1xf32>
    %110 = vector.broadcast %109 : vector<2x8x1xf32> to vector<2x8x8xf32>
    %111 = arith.subf %107, %110 : vector<2x8x8xf32>
    %112 = math.exp %111 : vector<2x8x8xf32>
    %cst_34 = arith.constant dense<0.000000e+00> : vector<2x8xf32>
    %113 = vector.multi_reduction <add>, %112, %cst_34 [2] : vector<2x8x8xf32> to vector<2x8xf32>
    %114 = vector.shape_cast %113 : vector<2x8xf32> to vector<2x8x1xf32>
    %115 = vector.broadcast %114 : vector<2x8x1xf32> to vector<2x8x8xf32>
    %116 = arith.divf %112, %115 : vector<2x8x8xf32>
    %117 = vector.extract_strided_slice %104 {offsets = [0, 0, 0], sizes = [2, 8, 8], strides = [1, 1, 1]} : vector<2x8x32xf32> to vector<2x8x8xf32>
    "tpu.trace_start"() <{level = 10 : i32, message = "bts,bse->bte"}> : () -> ()
    %cst_35 = arith.constant dense<0.000000e+00> : vector<2x8x8xf32>
    %118 = tpu.matmul %116, %117, %cst_35 {dimension_numbers = #tpu.dot_dimension_numbers<[2], [1], [1], [2], [0, 0, 0, 1, 1, 2], [0], [0]>} : vector<2x8x8xf32>, vector<2x8x8xf32>, vector<2x8x8xf32> -> vector<2x8x8xf32>
    "tpu.trace_stop"() : () -> ()
    %119 = vector.shape_cast %118 : vector<2x8x8xf32> to vector<16x8xf32>
    %120 = vector.extract_strided_slice %2 {offsets = [0, 0], sizes = [8, 32], strides = [1, 1]} : vector<32x32xf32> to vector<8x32xf32>
    %cst_36 = arith.constant dense<0.000000e+00> : vector<16x32xf32>
    %121 = tpu.matmul %119, %120, %cst_36 {dimension_numbers = #tpu.dot_dimension_numbers<[1], [0], [0], [1], [0, 0, 1, 1], [], []>} : vector<16x8xf32>, vector<8x32xf32>, vector<16x32xf32> -> vector<16x32xf32>
    %122 = arith.addf %98, %121 : vector<16x32xf32>
    %123 = vector.extract_strided_slice %100 {offsets = [0, 0, 8], sizes = [2, 8, 8], strides = [1, 1, 1]} : vector<2x8x32xf32> to vector<2x8x8xf32>
    %124 = vector.extract_strided_slice %102 {offsets = [0, 0, 8], sizes = [2, 8, 8], strides = [1, 1, 1]} : vector<2x8x32xf32> to vector<2x8x8xf32>
    "tpu.trace_start"() <{level = 10 : i32, message = "bte,bse->bts"}> : () -> ()
    %cst_37 = arith.constant dense<0.000000e+00> : vector<2x8x8xf32>
    %125 = tpu.matmul %123, %124, %cst_37 {dimension_numbers = #tpu.dot_dimension_numbers<[2], [2], [1], [1], [0, 0, 0, 1, 1, 1], [0], [0]>} : vector<2x8x8xf32>, vector<2x8x8xf32>, vector<2x8x8xf32> -> vector<2x8x8xf32>
    "tpu.trace_stop"() : () -> ()
    %cst_38 = arith.constant dense<0xFF800000> : vector<2x8xf32>
    %126 = vector.multi_reduction <maximumf>, %125, %cst_38 [2] : vector<2x8x8xf32> to vector<2x8xf32>
    %127 = vector.shape_cast %126 : vector<2x8xf32> to vector<2x8x1xf32>
    %128 = vector.broadcast %127 : vector<2x8x1xf32> to vector<2x8x8xf32>
    %129 = arith.subf %125, %128 : vector<2x8x8xf32>
    %130 = math.exp %129 : vector<2x8x8xf32>
    %cst_39 = arith.constant dense<0.000000e+00> : vector<2x8xf32>
    %131 = vector.multi_reduction <add>, %130, %cst_39 [2] : vector<2x8x8xf32> to vector<2x8xf32>
    %132 = vector.shape_cast %131 : vector<2x8xf32> to vector<2x8x1xf32>
    %133 = vector.broadcast %132 : vector<2x8x1xf32> to vector<2x8x8xf32>
    %134 = arith.divf %130, %133 : vector<2x8x8xf32>
    %135 = vector.extract_strided_slice %104 {offsets = [0, 0, 8], sizes = [2, 8, 8], strides = [1, 1, 1]} : vector<2x8x32xf32> to vector<2x8x8xf32>
    "tpu.trace_start"() <{level = 10 : i32, message = "bts,bse->bte"}> : () -> ()
    %cst_40 = arith.constant dense<0.000000e+00> : vector<2x8x8xf32>
    %136 = tpu.matmul %134, %135, %cst_40 {dimension_numbers = #tpu.dot_dimension_numbers<[2], [1], [1], [2], [0, 0, 0, 1, 1, 2], [0], [0]>} : vector<2x8x8xf32>, vector<2x8x8xf32>, vector<2x8x8xf32> -> vector<2x8x8xf32>
    "tpu.trace_stop"() : () -> ()
    %137 = vector.shape_cast %136 : vector<2x8x8xf32> to vector<16x8xf32>
    %138 = vector.extract_strided_slice %2 {offsets = [8, 0], sizes = [8, 32], strides = [1, 1]} : vector<32x32xf32> to vector<8x32xf32>
    %cst_41 = arith.constant dense<0.000000e+00> : vector<16x32xf32>
    %139 = tpu.matmul %137, %138, %cst_41 {dimension_numbers = #tpu.dot_dimension_numbers<[1], [0], [0], [1], [0, 0, 1, 1], [], []>} : vector<16x8xf32>, vector<8x32xf32>, vector<16x32xf32> -> vector<16x32xf32>
    %140 = arith.addf %122, %139 : vector<16x32xf32>
    %141 = vector.extract_strided_slice %100 {offsets = [0, 0, 16], sizes = [2, 8, 8], strides = [1, 1, 1]} : vector<2x8x32xf32> to vector<2x8x8xf32>
    %142 = vector.extract_strided_slice %102 {offsets = [0, 0, 16], sizes = [2, 8, 8], strides = [1, 1, 1]} : vector<2x8x32xf32> to vector<2x8x8xf32>
    "tpu.trace_start"() <{level = 10 : i32, message = "bte,bse->bts"}> : () -> ()
    %cst_42 = arith.constant dense<0.000000e+00> : vector<2x8x8xf32>
    %143 = tpu.matmul %141, %142, %cst_42 {dimension_numbers = #tpu.dot_dimension_numbers<[2], [2], [1], [1], [0, 0, 0, 1, 1, 1], [0], [0]>} : vector<2x8x8xf32>, vector<2x8x8xf32>, vector<2x8x8xf32> -> vector<2x8x8xf32>
    "tpu.trace_stop"() : () -> ()
    %cst_43 = arith.constant dense<0xFF800000> : vector<2x8xf32>
    %144 = vector.multi_reduction <maximumf>, %143, %cst_43 [2] : vector<2x8x8xf32> to vector<2x8xf32>
    %145 = vector.shape_cast %144 : vector<2x8xf32> to vector<2x8x1xf32>
    %146 = vector.broadcast %145 : vector<2x8x1xf32> to vector<2x8x8xf32>
    %147 = arith.subf %143, %146 : vector<2x8x8xf32>
    %148 = math.exp %147 : vector<2x8x8xf32>
    %cst_44 = arith.constant dense<0.000000e+00> : vector<2x8xf32>
    %149 = vector.multi_reduction <add>, %148, %cst_44 [2] : vector<2x8x8xf32> to vector<2x8xf32>
    %150 = vector.shape_cast %149 : vector<2x8xf32> to vector<2x8x1xf32>
    %151 = vector.broadcast %150 : vector<2x8x1xf32> to vector<2x8x8xf32>
    %152 = arith.divf %148, %151 : vector<2x8x8xf32>
    %153 = vector.extract_strided_slice %104 {offsets = [0, 0, 16], sizes = [2, 8, 8], strides = [1, 1, 1]} : vector<2x8x32xf32> to vector<2x8x8xf32>
    "tpu.trace_start"() <{level = 10 : i32, message = "bts,bse->bte"}> : () -> ()
    %cst_45 = arith.constant dense<0.000000e+00> : vector<2x8x8xf32>
    %154 = tpu.matmul %152, %153, %cst_45 {dimension_numbers = #tpu.dot_dimension_numbers<[2], [1], [1], [2], [0, 0, 0, 1, 1, 2], [0], [0]>} : vector<2x8x8xf32>, vector<2x8x8xf32>, vector<2x8x8xf32> -> vector<2x8x8xf32>
    "tpu.trace_stop"() : () -> ()
    %155 = vector.shape_cast %154 : vector<2x8x8xf32> to vector<16x8xf32>
    %156 = vector.extract_strided_slice %2 {offsets = [16, 0], sizes = [8, 32], strides = [1, 1]} : vector<32x32xf32> to vector<8x32xf32>
    %cst_46 = arith.constant dense<0.000000e+00> : vector<16x32xf32>
    %157 = tpu.matmul %155, %156, %cst_46 {dimension_numbers = #tpu.dot_dimension_numbers<[1], [0], [0], [1], [0, 0, 1, 1], [], []>} : vector<16x8xf32>, vector<8x32xf32>, vector<16x32xf32> -> vector<16x32xf32>
    %158 = arith.addf %140, %157 : vector<16x32xf32>
    %159 = vector.extract_strided_slice %100 {offsets = [0, 0, 24], sizes = [2, 8, 8], strides = [1, 1, 1]} : vector<2x8x32xf32> to vector<2x8x8xf32>
    %160 = vector.extract_strided_slice %102 {offsets = [0, 0, 24], sizes = [2, 8, 8], strides = [1, 1, 1]} : vector<2x8x32xf32> to vector<2x8x8xf32>
    "tpu.trace_start"() <{level = 10 : i32, message = "bte,bse->bts"}> : () -> ()
    %cst_47 = arith.constant dense<0.000000e+00> : vector<2x8x8xf32>
    %161 = tpu.matmul %159, %160, %cst_47 {dimension_numbers = #tpu.dot_dimension_numbers<[2], [2], [1], [1], [0, 0, 0, 1, 1, 1], [0], [0]>} : vector<2x8x8xf32>, vector<2x8x8xf32>, vector<2x8x8xf32> -> vector<2x8x8xf32>
    "tpu.trace_stop"() : () -> ()
    %cst_48 = arith.constant dense<0xFF800000> : vector<2x8xf32>
    %162 = vector.multi_reduction <maximumf>, %161, %cst_48 [2] : vector<2x8x8xf32> to vector<2x8xf32>
    %163 = vector.shape_cast %162 : vector<2x8xf32> to vector<2x8x1xf32>
    %164 = vector.broadcast %163 : vector<2x8x1xf32> to vector<2x8x8xf32>
    %165 = arith.subf %161, %164 : vector<2x8x8xf32>
    %166 = math.exp %165 : vector<2x8x8xf32>
    %cst_49 = arith.constant dense<0.000000e+00> : vector<2x8xf32>
    %167 = vector.multi_reduction <add>, %166, %cst_49 [2] : vector<2x8x8xf32> to vector<2x8xf32>
    %168 = vector.shape_cast %167 : vector<2x8xf32> to vector<2x8x1xf32>
    %169 = vector.broadcast %168 : vector<2x8x1xf32> to vector<2x8x8xf32>
    %170 = arith.divf %166, %169 : vector<2x8x8xf32>
    %171 = vector.extract_strided_slice %104 {offsets = [0, 0, 24], sizes = [2, 8, 8], strides = [1, 1, 1]} : vector<2x8x32xf32> to vector<2x8x8xf32>
    "tpu.trace_start"() <{level = 10 : i32, message = "bts,bse->bte"}> : () -> ()
    %cst_50 = arith.constant dense<0.000000e+00> : vector<2x8x8xf32>
    %172 = tpu.matmul %170, %171, %cst_50 {dimension_numbers = #tpu.dot_dimension_numbers<[2], [1], [1], [2], [0, 0, 0, 1, 1, 2], [0], [0]>} : vector<2x8x8xf32>, vector<2x8x8xf32>, vector<2x8x8xf32> -> vector<2x8x8xf32>
    "tpu.trace_stop"() : () -> ()
    %173 = vector.shape_cast %172 : vector<2x8x8xf32> to vector<16x8xf32>
    %174 = vector.extract_strided_slice %2 {offsets = [24, 0], sizes = [8, 32], strides = [1, 1]} : vector<32x32xf32> to vector<8x32xf32>
    %cst_51 = arith.constant dense<0.000000e+00> : vector<16x32xf32>
    %175 = tpu.matmul %173, %174, %cst_51 {dimension_numbers = #tpu.dot_dimension_numbers<[1], [0], [0], [1], [0, 0, 1, 1], [], []>} : vector<16x8xf32>, vector<8x32xf32>, vector<16x32xf32> -> vector<16x32xf32>
    %176 = arith.addf %158, %175 : vector<16x32xf32>
    %cst_52 = arith.constant 0.000000e+00 : f32
    %177 = vector.broadcast %cst_52 : f32 to vector<16x32xf32>
    %178 = arith.maximumf %176, %177 : vector<16x32xf32>
    %179 = vector.shape_cast %178 : vector<16x32xf32> to vector<2x8x32xf32>
    %c0_53 = arith.constant 0 : index
    %c0_54 = arith.constant 0 : index
    %180 = vector.load %arg0[%c0_53, %c0_54] : memref<2x32xf32, #tpu.memory_space<vmem>>, vector<2x32xf32>
    %cst_55 = arith.constant dense<0.000000e+00> : vector<2x128xf32>
    %181 = tpu.matmul %180, %1, %cst_55 {dimension_numbers = #tpu.dot_dimension_numbers<[1], [0], [0], [1], [0, 0, 1, 1], [], []>} : vector<2x32xf32>, vector<32x128xf32>, vector<2x128xf32> -> vector<2x128xf32>
    %182 = vector.extract_strided_slice %181 {offsets = [0, 96], sizes = [2, 32], strides = [1, 1]} : vector<2x128xf32> to vector<2x32xf32>
    %183 = vector.broadcast %4 : vector<1x32xf32> to vector<2x32xf32>
    %184 = arith.addf %182, %183 : vector<2x32xf32>
    %185 = vector.extract_strided_slice %181 {offsets = [0, 64], sizes = [2, 32], strides = [1, 1]} : vector<2x128xf32> to vector<2x32xf32>
    %cst_56 = arith.constant dense<0.000000e+00> : vector<2x32xf32>
    %186 = tpu.matmul %185, %2, %cst_56 {dimension_numbers = #tpu.dot_dimension_numbers<[1], [0], [0], [1], [0, 0, 1, 1], [], []>} : vector<2x32xf32>, vector<32x32xf32>, vector<2x32xf32> -> vector<2x32xf32>
    %187 = arith.addf %184, %186 : vector<2x32xf32>
    %cst_57 = arith.constant 0.000000e+00 : f32
    %188 = vector.broadcast %cst_57 : f32 to vector<2x32xf32>
    %189 = arith.maximumf %187, %188 : vector<2x32xf32>
    %cst_58 = arith.constant dense<0.000000e+00> : vector<2x512xf32>
    %190 = tpu.matmul %189, %3, %cst_58 {dimension_numbers = #tpu.dot_dimension_numbers<[1], [0], [0], [1], [0, 0, 1, 1], [], []>} : vector<2x32xf32>, vector<32x512xf32>, vector<2x512xf32> -> vector<2x512xf32>
    %191 = vector.broadcast %5 : vector<1x512xf32> to vector<2x512xf32>
    %192 = arith.addf %190, %191 : vector<2x512xf32>
    %cst_59 = arith.constant 0.000000e+00 : f32
    %193 = vector.broadcast %cst_59 : f32 to vector<2x1x32xf32>
    %194 = tpu.concatenate %92, %193 in 1 : vector<2x8x32xf32>, vector<2x1x32xf32> -> vector<2x9x32xf32>
    %cst_60 = arith.constant 0.000000e+00 : f32
    %195 = vector.broadcast %cst_60 : f32 to vector<2x1x32xf32>
    %196 = tpu.concatenate %179, %195 in 1 : vector<2x8x32xf32>, vector<2x1x32xf32> -> vector<2x9x32xf32>
    %c0_61 = arith.constant 0 : index
    %c0_62 = arith.constant 0 : index
    %c0_63 = arith.constant 0 : index
    %197 = vector.load %arg3[%c0_61, %c0_62, %c0_63] : memref<2x8x32xf32, #tpu.memory_space<vmem>>, vector<2x8x32xf32>
    %198 = vector.extract_strided_slice %192 {offsets = [0, 0], sizes = [2, 206], strides = [1, 1]} : vector<2x512xf32> to vector<2x206xf32>
    %199 = vector.extract_strided_slice %192 {offsets = [0, 256], sizes = [2, 32], strides = [1, 1]} : vector<2x512xf32> to vector<2x32xf32>
    %200 = vector.shape_cast %199 : vector<2x32xf32> to vector<2x1x32xf32>
    "tpu.trace_start"() <{level = 10 : i32, message = "bkh,bth->bkt"}> : () -> ()
    %cst_64 = arith.constant dense<0.000000e+00> : vector<2x1x9xf32>
    %201 = tpu.matmul %200, %194, %cst_64 {dimension_numbers = #tpu.dot_dimension_numbers<[2], [2], [1], [1], [0, 0, 0, 1, 1, 1], [0], [0]>} : vector<2x1x32xf32>, vector<2x9x32xf32>, vector<2x1x9xf32> -> vector<2x1x9xf32>
    "tpu.trace_stop"() : () -> ()
    %202 = vector.shape_cast %201 : vector<2x1x9xf32> to vector<2x9xf32>
    %203 = vector.extract_strided_slice %192 {offsets = [0, 288], sizes = [2, 32], strides = [1, 1]} : vector<2x512xf32> to vector<2x32xf32>
    %204 = vector.shape_cast %203 : vector<2x32xf32> to vector<2x1x32xf32>
    "tpu.trace_start"() <{level = 10 : i32, message = "bkh,bth->bkt"}> : () -> ()
    %cst_65 = arith.constant dense<0.000000e+00> : vector<2x1x9xf32>
    %205 = tpu.matmul %204, %194, %cst_65 {dimension_numbers = #tpu.dot_dimension_numbers<[2], [2], [1], [1], [0, 0, 0, 1, 1, 1], [0], [0]>} : vector<2x1x32xf32>, vector<2x9x32xf32>, vector<2x1x9xf32> -> vector<2x1x9xf32>
    "tpu.trace_stop"() : () -> ()
    %206 = vector.shape_cast %205 : vector<2x1x9xf32> to vector<2x9xf32>
    %207 = vector.extract_strided_slice %192 {offsets = [0, 320], sizes = [2, 32], strides = [1, 1]} : vector<2x512xf32> to vector<2x32xf32>
    %208 = vector.shape_cast %207 : vector<2x32xf32> to vector<2x1x32xf32>
    "tpu.trace_start"() <{level = 10 : i32, message = "bkh,bth->bkt"}> : () -> ()
    %cst_66 = arith.constant dense<0.000000e+00> : vector<2x1x9xf32>
    %209 = tpu.matmul %208, %194, %cst_66 {dimension_numbers = #tpu.dot_dimension_numbers<[2], [2], [1], [1], [0, 0, 0, 1, 1, 1], [0], [0]>} : vector<2x1x32xf32>, vector<2x9x32xf32>, vector<2x1x9xf32> -> vector<2x1x9xf32>
    "tpu.trace_stop"() : () -> ()
    %210 = vector.shape_cast %209 : vector<2x1x9xf32> to vector<2x9xf32>
    %211 = vector.extract_strided_slice %192 {offsets = [0, 352], sizes = [2, 32], strides = [1, 1]} : vector<2x512xf32> to vector<2x32xf32>
    %212 = vector.shape_cast %211 : vector<2x32xf32> to vector<2x1x32xf32>
    "tpu.trace_start"() <{level = 10 : i32, message = "bkh,bth->bkt"}> : () -> ()
    %cst_67 = arith.constant dense<0.000000e+00> : vector<2x1x9xf32>
    %213 = tpu.matmul %212, %196, %cst_67 {dimension_numbers = #tpu.dot_dimension_numbers<[2], [2], [1], [1], [0, 0, 0, 1, 1, 1], [0], [0]>} : vector<2x1x32xf32>, vector<2x9x32xf32>, vector<2x1x9xf32> -> vector<2x1x9xf32>
    "tpu.trace_stop"() : () -> ()
    %214 = vector.shape_cast %213 : vector<2x1x9xf32> to vector<2x9xf32>
    %215 = vector.extract_strided_slice %192 {offsets = [0, 384], sizes = [2, 32], strides = [1, 1]} : vector<2x512xf32> to vector<2x32xf32>
    %216 = vector.shape_cast %215 : vector<2x32xf32> to vector<2x1x32xf32>
    "tpu.trace_start"() <{level = 10 : i32, message = "bkh,bth->bkt"}> : () -> ()
    %cst_68 = arith.constant dense<0.000000e+00> : vector<2x1x9xf32>
    %217 = tpu.matmul %216, %196, %cst_68 {dimension_numbers = #tpu.dot_dimension_numbers<[2], [2], [1], [1], [0, 0, 0, 1, 1, 1], [0], [0]>} : vector<2x1x32xf32>, vector<2x9x32xf32>, vector<2x1x9xf32> -> vector<2x1x9xf32>
    "tpu.trace_stop"() : () -> ()
    %218 = vector.shape_cast %217 : vector<2x1x9xf32> to vector<2x9xf32>
    %219 = vector.extract_strided_slice %192 {offsets = [0, 416], sizes = [2, 32], strides = [1, 1]} : vector<2x512xf32> to vector<2x32xf32>
    %220 = vector.shape_cast %219 : vector<2x32xf32> to vector<2x1x32xf32>
    "tpu.trace_start"() <{level = 10 : i32, message = "bkh,bth->bkt"}> : () -> ()
    %cst_69 = arith.constant dense<0.000000e+00> : vector<2x1x9xf32>
    %221 = tpu.matmul %220, %196, %cst_69 {dimension_numbers = #tpu.dot_dimension_numbers<[2], [2], [1], [1], [0, 0, 0, 1, 1, 1], [0], [0]>} : vector<2x1x32xf32>, vector<2x9x32xf32>, vector<2x1x9xf32> -> vector<2x1x9xf32>
    "tpu.trace_stop"() : () -> ()
    %222 = vector.shape_cast %221 : vector<2x1x9xf32> to vector<2x9xf32>
    %223 = vector.extract_strided_slice %192 {offsets = [0, 448], sizes = [2, 32], strides = [1, 1]} : vector<2x512xf32> to vector<2x32xf32>
    %224 = vector.shape_cast %223 : vector<2x32xf32> to vector<2x1x32xf32>
    "tpu.trace_start"() <{level = 10 : i32, message = "bkh,bth->bkt"}> : () -> ()
    %cst_70 = arith.constant dense<0.000000e+00> : vector<2x1x9xf32>
    %225 = tpu.matmul %224, %196, %cst_70 {dimension_numbers = #tpu.dot_dimension_numbers<[2], [2], [1], [1], [0, 0, 0, 1, 1, 1], [0], [0]>} : vector<2x1x32xf32>, vector<2x9x32xf32>, vector<2x1x9xf32> -> vector<2x1x9xf32>
    "tpu.trace_stop"() : () -> ()
    %226 = vector.shape_cast %225 : vector<2x1x9xf32> to vector<2x9xf32>
    %227 = vector.extract_strided_slice %192 {offsets = [0, 480], sizes = [2, 32], strides = [1, 1]} : vector<2x512xf32> to vector<2x32xf32>
    %228 = vector.shape_cast %227 : vector<2x32xf32> to vector<2x1x32xf32>
    "tpu.trace_start"() <{level = 10 : i32, message = "bkh,bth->bkt"}> : () -> ()
    %cst_71 = arith.constant dense<0.000000e+00> : vector<2x1x8xf32>
    %229 = tpu.matmul %228, %197, %cst_71 {dimension_numbers = #tpu.dot_dimension_numbers<[2], [2], [1], [1], [0, 0, 0, 1, 1, 1], [0], [0]>} : vector<2x1x32xf32>, vector<2x8x32xf32>, vector<2x1x8xf32> -> vector<2x1x8xf32>
    "tpu.trace_stop"() : () -> ()
    %230 = vector.shape_cast %229 : vector<2x1x8xf32> to vector<2x8xf32>
    %cst_72 = arith.constant 0.000000e+00 : f32
    %231 = vector.broadcast %cst_72 : f32 to vector<2x107xf32>
    %232 = tpu.concatenate %198, %202, %206, %210, %214, %218, %222, %226, %230, %231 in 1 : vector<2x206xf32>, vector<2x9xf32>, vector<2x9xf32>, vector<2x9xf32>, vector<2x9xf32>, vector<2x9xf32>, vector<2x9xf32>, vector<2x9xf32>, vector<2x8xf32>, vector<2x107xf32> -> vector<2x384xf32>
    %c0_73 = arith.constant 0 : index
    %c0_74 = arith.constant 0 : index
    %233 = vector.load %arg4[%c0_73, %c0_74] : memref<2x384xi32, #tpu.memory_space<vmem>>, vector<2x384xi32>
    %c0_i32 = arith.constant 0 : i32
    %234 = vector.broadcast %c0_i32 : i32 to vector<2x384xi32>
    %235 = arith.cmpi eq, %233, %234 : vector<2x384xi32>
    %cst_75 = arith.constant -1.000000e+09 : f32
    %236 = vector.broadcast %cst_75 : f32 to vector<2x384xf32>
    %237 = arith.select %235, %236, %232 : vector<2x384xi1>, vector<2x384xf32>
    %c0_76 = arith.constant 0 : index
    %c0_77 = arith.constant 0 : index
    %238 = vector.load %arg7[%c0_76, %c0_77] : memref<2x384xf32, #tpu.memory_space<vmem>>, vector<2x384xf32>
    tpu.vector_store %arg7[%c0_76, %c0_77], %237 {strides = array<i32>} : memref<2x384xf32, #tpu.memory_space<vmem>>, vector<2x384xf32>,
    return
  }
}

</mosaic_0001>

<bundles_post_ra>
// kernel: tpu_custom_call.1
= control target key start
LH: loop header
LB: loop body
LE: loop exit
PB: predicated region body
PF: predicated region fallthrough
CT: control target
= control target key end

     0   :  { %12 = vsyncpa [#allocation3], 0  ;;  %s7335_s0 = inlined_call_operand.hbm [shape: f32[2,32], index: 0, kind: input, shape index: {}]   ;;  %s7336_s1 = inlined_call_operand.hbm [shape: f32[2,8,32], index: 1, kind: input, shape index: {}]   ;;  %s7337_s2 = inlined_call_operand.hbm [shape: f32[2,8,32], index: 2, kind: input, shape index: {}]   ;;  %s7338_s3 = inlined_call_operand.hbm [shape: f32[2,8,32], index: 3, kind: input, shape index: {}]   ;;  %s7339_s4 = inlined_call_operand.vmem [shape: s32[2,384], index: 4, kind: input, shape index: {}]   ;;  %s7340_s5 = inlined_call_operand.hbm [shape: f32[32,672], index: 5, kind: input, shape index: {}]   ;;  %s7341_s6 = inlined_call_operand.vmem [shape: f32[1,544], index: 6, kind: input, shape index: {}]   ;;  %s7342_s7 = inlined_call_operand.hbm [shape: f32[2,384], index: 7, kind: output, shape index: {}]  }
   0x1   :  { %13 = vsyncpa [#allocation6], 0 }
   0x2   :  { %14 = vsyncpa [#allocation9], 0 }
   0x3   :  { %15 = vsyncpa [#allocation4], 0  ;;  %s6508_s24 = smov [#allocation5]   ;;  %s6368_s28 = scalar_lea.hbm %s7336_s1, 256 }
   0x4   :  { %s31_s25 = sshll.u32 %s6508_s24, 4  ;;  %p6369_p0 = scmp.ne.s32.totalorder %s7336_s1, %s6368_s28  ;;  %s32_s25 = int_to_ptr.vmem [resolvable:$true] %s31_s25 }
   0x5   :  { %p6372_p1 = scmp.lt.u32.totalorder %s6368_s28, %s7336_s1 }
   0x7   :  { %p6374_p2 = pnand %p6372_p1, %p6369_p0 }
   0x9   :  { %6377 = shalt.err (!%p6374_p2)
}
   0xa   :  { %s6378_s10 = scalar_lea.vmem %s32_s25, 256  ;;  %p6383_p4 = scmp.lt.s32.totalorder %s32_s25, %s32_s25 }
   0xb   :  { %p6379_p3 = scmp.ne.s32.totalorder %s32_s25, %s6378_s10  ;;  %p6384_p5 = scmp.lt.s32.totalorder %s6378_s10, %s6378_s10 }
   0xd   :  { %p6385_p6 = por %p6384_p5, %p6383_p4 }
   0xf   :  { %p6386_p7 = pnand %p6385_p6, %p6379_p3 }
  0x11   :  { %6389 = shalt.err (!%p6386_p7)
}
  0x12   :  { %s6509_s11 = smov 128   ;;  %s6510_s12 = smov 8  }
  0x13   :  { %37 = dma.hbm_to_vmem [thread:$0]  %s7336_s1, 256, %s32_s25, [#allocation6], %s6509_s11, %s6509_s11, %s6510_s12  }
  0x14   :  { %s6511_s15 = smov [#allocation8]   ;;  %s6512_s17 = smov [#allocation2]  }
  0x15   :  { %s55_s16 = sshll.u32 %s6511_s15, 4  ;;  %s22_s18 = sshll.u32 %s6512_s17, 4  ;;  %s56_s16 = int_to_ptr.vmem [resolvable:$true] %s55_s16  ;;  %s23_s18 = int_to_ptr.vmem [resolvable:$true] %s22_s18 }
  0x16   :  { %s6390_s21 = scalar_lea.hbm %s7338_s3, 256 }
  0x17   :  { %p6391_p8 = scmp.ne.s32.totalorder %s7338_s3, %s6390_s21  ;;  %p6394_p9 = scmp.lt.u32.totalorder %s6390_s21, %s7338_s3 }
  0x19   :  { %p6396_p10 = pnand %p6394_p9, %p6391_p8 }
  0x1b   :  { %6399 = shalt.err (!%p6396_p10)
}
  0x1c   :  { %s6400_s1 = scalar_lea.vmem %s56_s16, 256  ;;  %p6405_p12 = scmp.lt.s32.totalorder %s56_s16, %s56_s16 }
  0x1d   :  { %p6401_p11 = scmp.ne.s32.totalorder %s56_s16, %s6400_s1  ;;  %p6406_p13 = scmp.lt.s32.totalorder %s6400_s1, %s6400_s1 }
  0x1f   :  { %p6407_p0 = por %p6406_p13, %p6405_p12 }
  0x21   :  { %p6408_p1 = pnand %p6407_p0, %p6401_p11 }
  0x23   :  { %6411 = shalt.err (!%p6408_p1)
}
  0x24   :  { %61 = dma.hbm_to_vmem [thread:$0]  %s7338_s3, 256, %s56_s16, [#allocation9], %s6509_s11, %s6509_s11, %s6510_s12  }
  0x25   :  { %s6412_s30 = scalar_lea.hbm %s7335_s0, 32 }
  0x26   :  { %p6413_p2 = scmp.ne.s32.totalorder %s7335_s0, %s6412_s30  ;;  %p6416_p3 = scmp.lt.u32.totalorder %s6412_s30, %s7335_s0 }
  0x28   :  { %p6418_p4 = pnand %p6416_p3, %p6413_p2 }
  0x2a   :  { %6421 = shalt.err (!%p6418_p4)
}
  0x2b   :  { %s6422_s14 = scalar_lea.vmem %s23_s18, 32  ;;  %p6427_p6 = scmp.lt.s32.totalorder %s23_s18, %s23_s18 }
  0x2c   :  { %p6423_p5 = scmp.ne.s32.totalorder %s23_s18, %s6422_s14  ;;  %p6428_p7 = scmp.lt.s32.totalorder %s6422_s14, %s6422_s14 }
  0x2e   :  { %p6429_p8 = por %p6428_p7, %p6427_p6 }
  0x30   :  { %p6430_p9 = pnand %p6429_p8, %p6423_p5 }
  0x32   :  { %6433 = shalt.err (!%p6430_p9)
}
  0x33   :  { %25 = dma.hbm_to_vmem [thread:$0]  %s7335_s0, 32, %s23_s18, [#allocation3]  }
  0x34   :  { %s6513_s16 = smov [#allocation7]   ;;  %s6514_s19 = smov [#allocation10]  }
  0x35   :  { %s43_s17 = sshll.u32 %s6513_s16, 4  ;;  %s69_s20 = sshll.u32 %s6514_s19, 4  ;;  %s44_s17 = int_to_ptr.vmem [resolvable:$true] %s43_s17  ;;  %s70_s20 = int_to_ptr.vmem [resolvable:$true] %s69_s20 }
  0x36   :  { %s6434_s23 = scalar_lea.hbm %s7337_s2, 256 }
  0x37   :  { %p6435_p10 = scmp.ne.s32.totalorder %s7337_s2, %s6434_s23  ;;  %p6438_p11 = scmp.lt.u32.totalorder %s6434_s23, %s7337_s2 }
  0x39   :  { %p6440_p12 = pnand %p6438_p11, %p6435_p10 }
  0x3b   :  { %6443 = shalt.err (!%p6440_p12)
}
  0x3c   :  { %s6444_s0 = scalar_lea.vmem %s44_s17, 256  ;;  %p6449_p0 = scmp.lt.s32.totalorder %s44_s17, %s44_s17 }
  0x3d   :  { %p6445_p13 = scmp.ne.s32.totalorder %s44_s17, %s6444_s0  ;;  %p6450_p1 = scmp.lt.s32.totalorder %s6444_s0, %s6444_s0 }
  0x3f   :  { %p6451_p2 = por %p6450_p1, %p6449_p0 }
  0x41   :  { %p6452_p3 = pnand %p6451_p2, %p6445_p13 }
  0x43   :  { %6455 = shalt.err (!%p6452_p3)
}
  0x44   :  { %49 = dma.hbm_to_vmem [thread:$0]  %s7337_s2, 256, %s44_s17, [#allocation6], %s6509_s11, %s6509_s11, %s6510_s12  }
  0x45   :  { %s6456_s30 = scalar_lea.hbm %s7340_s5, 3072 }
  0x46   :  { %p6457_p4 = scmp.ne.s32.totalorder %s7340_s5, %s6456_s30  ;;  %p6460_p5 = scmp.lt.u32.totalorder %s6456_s30, %s7340_s5 }
  0x48   :  { %p6462_p6 = pnand %p6460_p5, %p6457_p4 }
  0x4a   :  { %6465 = shalt.err (!%p6462_p6)
}
  0x4b   :  { %s6466_s14 = scalar_lea.vmem %s70_s20, 3072  ;;  %p6471_p8 = scmp.lt.s32.totalorder %s70_s20, %s70_s20 }
  0x4c   :  { %p6467_p7 = scmp.ne.s32.totalorder %s70_s20, %s6466_s14  ;;  %p6472_p9 = scmp.lt.s32.totalorder %s6466_s14, %s6466_s14 }
  0x4e   :  { %p6473_p10 = por %p6472_p9, %p6471_p8 }
  0x50   :  { %p6474_p11 = pnand %p6473_p10, %p6467_p7 }
  0x52   :  { %6477 = shalt.err (!%p6474_p11)
}
  0x53   :  { %s6515_s2 = smov 768   ;;  %s6516_s11 = smov 48  }
  0x54   :  { %75 = dma.hbm_to_vmem [thread:$0]  %s7340_s5, 3072, %s70_s20, [#allocation9], %s6515_s2, %s6515_s2, %s6516_s11  }
  0x55   :  { %6500 = dma.done.wait [#allocation3], 32  }
  0x56   :  { %6501 = vsyncadd [#allocation3], 4294967264 }
  0x57   :  { %6502 = dma.done.wait [#allocation6], 512  }
  0x58   :  { %6503 = vsyncadd [#allocation6], 4294966784 }
  0x59   :  { %6504 = dma.done.wait [#allocation9], 3328  }
  0x5a   :  { %6505 = vsyncadd [#allocation9], 4294963968  ;;  %vm121_vm0 = vcmask 261120   ;;  %v93_v0 = vld [vmem:[#allocation10] sm:$0xff]  ;;  %v99_v1 = vld [vmem:[#allocation10 + $0x30] sm:$0xff]  ;;  %v6517_v8 = vmov 0.0  }
  0x5b   :  { %v105_v2 = vld [vmem:[#allocation10 + $0x60] sm:$0xff]  ;;  %v6651_v3 = vpack.c.bf16 %v99_v1, %v93_v0  ;;  %v111_v4 = vld [vmem:[#allocation10 + $0x90] sm:$0xff]  ;;  %v120_v7 = vld [vmem:[#allocation5 + $0x8] sm:$0xff]  ;;  %5774 = vmatprep.subr.mxu1 %v6517_v8  ;;  %vm6518_vm1 = vmmov 0   ;;  %s6519_s5 = smov 96   ;;  %vm216_vm2 = vcmask 64512  }
  0x5c   :  { %v119_v5 = vld [vmem:[#allocation5] sm:$0xff]  ;;  %v6653_v6 = vpack.c.bf16 %v111_v4, %v105_v2  ;;  %5776 = vmatprep.mubr.msk.f32.mxu1 %vm6518_vm1, %v6517_v8  ;;  %s6520_s15 = smov 64   ;;  %s6521_s16 = smov 120   ;;  %v6703_v30 = vld [vmem:[#allocation10 + $0x8] sm:$0xff]  ;;  %vm3907_vm3 = vcmask 785408   ;;  %vm7169_vm4 = vmpackc.low %vm121_vm0, %vm121_vm0  ;;  %vm5376_vm5 = vcmask 1041409  }
  0x5d   :  { %5771 = vmatprep.mubr.msk.f32.mxu0 %vm121_vm0, %v119_v5  ;;  %6116 = vmatprep.subr.bf16.mxu0 %v6651_v3  ;;  %s6522_s17 = smov 88   ;;  %s6523_s19 = smov 56   ;;  %vm5430_vm6 = vcmask 637952   ;;  %vm5432_vm7 = vcmask 711680   ;;  %vm5435_vm8 = vcmask 859136   ;;  %vm5437_vm9 = vcmask 932864  }
  0x5e   :  { %6118 = vmatpush3.bf16.msra.mxu0 %v6651_v3  ;;  %s6524_s20 = smov 112   ;;  %s6525_s21 = smov 80   ;;  %vm5439_vm10 = vcmask 1006592   ;;  %vm5441_vm11 = vcmask 31744   ;;  %vm5443_vm12 = vcmask 105472   ;;  %vm5445_vm13 = vcmask 171008  }
  0x5f   :  { %6120 = vmatprep.subr.bf16.mxu0 %v6653_v6  ;;  %s6526_s22 = smov 72   ;;  %s6527_s23 = smov 104  }
  0x60   :  { %s6528_s24 = smov 40   ;;  %s6532_s18 = smov 78  }
  0x61   :  { %s6533_s27 = smov 87   ;;  %s6534_s28 = smov 105  }
  0x62   :  { %6122 = vmatpush3.bf16.msra.mxu0 %v6653_v6  ;;  %s6535_s29 = smov 114   ;;  %s6536_s30 = smov 123  }
  0x63   :  { %5784 = vmatprep.subr.mxu0 %v6517_v8  ;;  %s6537_s8 = smov 4   ;;  %s6538_s9 = smov 13  }
  0x64   :  { %s6540_s14 = smov [#allocation11]  }
  0x65   :  { %5772 = vmatmul.mubr.msk.f32.vlgmr.msra.gmra.mrb[0].mxu0 %vm121_vm0, %v120_v7  ;;  %s5477_s2 = sshll.u32 %s6540_s14, 4  ;;  %s5478_s2 = int_to_ptr.vmem [resolvable:$true] %s5477_s2 }
  0x66   :  { %5786 = vmatprep.mubr.msk.f32.mxu0 %vm6518_vm1, %v6517_v8  ;;  %p6483_p13 = scmp.lt.s32.totalorder %s5478_s2, %s5478_s2 }
 0x138   :  { %v6667_v9 = vpop.f32.mrb[0].mxu0 }
 0x139   :  { %v6669_v10 = vpop.f32.mrb[1].mxu0 }
 0x13a   :  { %214 = vrot.lane.b32.xlu0 %v6669_v10, %s6519_s5 }
 0x13e   :  { %292 = vrot.lane.b32.xlu0 %v6667_v9, %s6519_s5 }
 0x1ac   :  { %v215_v11 = vpop.permute.xlu0 %214 }
 0x1ad   :  { %5775 = vmatpush3.xpose.msk.msra.mxu1 %vm216_vm2, %v215_v11 }
 0x1ae   :  { %5779 = vmatprep.subr.mxu1 %v6517_v8 }
 0x1b0   :  { %5777 = vmatmul.mubr.msk.f32.vlgmr.msra.gmra.mrb[0].mxu1 %vm216_vm2, %v6669_v10  ;;  %v293_v12 = vpop.permute.xlu0 %292 }
 0x1b1   :  { %5780 = vmatpush3.xpose.msk.msra.mxu1 %vm216_vm2, %v293_v12  ;;  %5781 = vmatprep.mubr.msk.f32.mxu1 %vm6518_vm1, %v6517_v8 }
 0x1b2   :  { %5789 = vmatprep.subr.mxu1 %v6517_v8 }
 0x1b4   :  { %5782 = vmatmul.mubr.msk.f32.vlgmr.msra.gmra.mrb[2].mxu1 %vm216_vm2, %v6667_v9 }
 0x1b5   :  { %5791 = vmatprep.mubr.msk.f32.mxu1 %vm6518_vm1, %v6517_v8 }
 0x283   :  { %v287_v13 = vpop.f32.mrb[0].mxu1 }
 0x284   :  { %v5778_v14 = vpop.f32.mrb[1].mxu1  ;;  %v368_v15 = vsel %vm216_vm2, %v287_v13, -inf }
 0x285   :  { %369 = vmax.xlane.f32.xlu1 %v368_v15  ;;  %v6757_v15 = vld [vmem:[#allocation10 + $0x38] sm:$0xff] }
 0x287   :  { %v364_v16 = vpop.f32.mrb[2].mxu1 }
 0x288   :  { %v5783_v17 = vpop.f32.mrb[3].mxu1  ;;  %v371_v18 = vsel %vm216_vm2, %v364_v16, -inf }
 0x289   :  { %372 = vmax.xlane.f32.xlu1 %v371_v18 }
 0x29a   :  { %390 = vrot.lane.b32.xlu1 %v6669_v10, %s6520_s15 }
 0x312   :  { %v370_v19 = vpop.xlane.xlu1 %369 }
 0x313   :  { %v374_v20 = vsub.f32 %v287_v13, %v370_v19 }
 0x315   :  { %v376_v21 = vmul.f32 1.442695, %v374_v20 }
 0x316   :  { %v373_v22 = vpop.xlane.xlu1 %372 }
 0x317   :  { %6303 = vpow2.f32 %v376_v21  ;;  %v375_v23 = vsub.f32 %v364_v16, %v373_v22 }
 0x319   :  { %v378_v24 = vmul.f32 1.442695, %v375_v23 }
 0x31a   :  { %v391_v25 = vpop.permute.xlu1 %390 }
 0x31b   :  { %6305 = vpow2.f32 %v378_v24  ;;  %5785 = vmatpush3.msra.mxu0 %v391_v25 }
 0x31c   :  { %5794 = vmatprep.subr.mxu0 %v6703_v30 }
 0x321   :  { %v6304_v26 = vpop.eup %6303 }
 0x322   :  { %v380_v27 = vsel %vm216_vm2, %v6304_v26, 0.0 }
 0x323   :  { %381 = vadd.xlane.f32.xlu0 %v380_v27 }
 0x325   :  { %v6306_v28 = vpop.eup %6305 }
 0x326   :  { %v383_v29 = vsel %vm216_vm2, %v6306_v28, 0.0 }
 0x327   :  { %384 = vadd.xlane.f32.xlu1 %v383_v29 }
 0x338   :  { %466 = vrot.lane.b32.xlu1 %v6667_v9, %s6520_s15 }
 0x339   :  { %633 = vrot.lane.b32.xlu0 %v6669_v10, %s6521_s16 }
 0x33c   :  { %635 = vrot.lane.b32.xlu1 %v6669_v10, %s6522_s17 }
 0x340   :  { %713 = vrot.lane.b32.xlu1 %v6667_v9, %s6522_s17 }
 0x344   :  { %711 = vrot.lane.b32.xlu1 %v6667_v9, %s6521_s16 }
 0x3b0   :  { %v382_v31 = vpop.xlane.xlu0 %381 }
 0x3b1   :  { %6307 = vrcp.f32 %v382_v31 }
 0x3b4   :  { %v385_v32 = vpop.xlane.xlu1 %384  ;;  %v634_v39 = vpop.permute.xlu0 %633 }
 0x3b5   :  { %6309 = vrcp.f32 %v385_v32 }
 0x3b8   :  { %v467_v33 = vpop.permute.xlu1 %466 }
 0x3b9   :  { %5790 = vmatpush3.msra.mxu1 %v467_v33 }
 0x3ba   :  { %5799 = vmatprep.subr.mxu1 %v6517_v8 }
 0x3bb   :  { %v6308_v34 = vpop.eup %6307 }
 0x3bc   :  { %v387_v35 = vmul.f32 %v6308_v34, %v6304_v26  ;;  %v636_v38 = vpop.permute.xlu1 %635 }
 0x3be   :  { %5787 = vmatmul.mubr.msk.f32.vlgmr.msra.gmra.mrb[2].mxu0 %vm216_vm2, %v387_v35 }
 0x3bf   :  { %v6310_v36 = vpop.eup %6309  ;;  %5795 = vmatpush3.msra.mxu0 %v6703_v30 }
 0x3c0   :  { %v389_v37 = vmul.f32 %v6310_v36, %v6306_v28  ;;  %5804 = vmatprep.subr.mxu0 %v6517_v8  ;;  %v714_v42 = vpop.permute.xlu1 %713 }
 0x3c2   :  { %5792 = vmatmul.mubr.msk.f32.vlgmr.msra.gmra.mrb[4].mxu1 %vm216_vm2, %v389_v37 }
 0x3c3   :  { %5800 = vmatpush3.xpose.msk.msra.mxu1 %vm216_vm2, %v636_v38  ;;  %5801 = vmatprep.mubr.msk.f32.mxu1 %vm6518_vm1, %v6517_v8 }
 0x3c4   :  { %5809 = vmatprep.subr.mxu1 %v6517_v8  ;;  %v712_v45 = vpop.permute.xlu1 %711 }
 0x3c6   :  { %5802 = vmatmul.mubr.msk.f32.vlgmr.msra.gmra.mrb[6].mxu1 %vm216_vm2, %v634_v39 }
 0x3c7   :  { %5811 = vmatprep.mubr.msk.f32.mxu1 %vm6518_vm1, %v6517_v8 }
 0x491   :  { %v462_v40 = vpop.f32.mrb[2].mxu0 }
 0x492   :  { %v5788_v41 = vpop.f32.mrb[3].mxu0  ;;  %5796 = vmatprep.mubr.msk.f32.mxu0 %vm216_vm2, %v462_v40 }
 0x495   :  { %v538_v43 = vpop.f32.mrb[4].mxu1 }
 0x496   :  { %v5793_v44 = vpop.f32.mrb[5].mxu1  ;;  %5797 = vmatmul.mubr.msk.f32.vlgmr.msra.gmra.mrb[4].mxu0 %vm216_vm2, %v538_v43 }
 0x497   :  { %5805 = vmatpush3.xpose.msk.msra.mxu0 %vm216_vm2, %v714_v42  ;;  %5806 = vmatprep.mubr.msk.f32.mxu0 %vm6518_vm1, %v6517_v8 }
 0x498   :  { %5814 = vmatprep.subr.mxu0 %v6517_v8 }
 0x499   :  { %v707_v46 = vpop.f32.mrb[6].mxu1 }
 0x49a   :  { %v5803_v47 = vpop.f32.mrb[7].mxu1  ;;  %5807 = vmatmul.mubr.msk.f32.vlgmr.msra.gmra.mrb[6].mxu0 %vm216_vm2, %v712_v45  ;;  %v789_v48 = vsel %vm216_vm2, %v707_v46, -inf  ;;  %v6792_v45 = vld [vmem:[#allocation10 + $0x68] sm:$0xff] }
 0x49b   :  { %790 = vmax.xlane.f32.xlu1 %v789_v48  ;;  %5816 = vmatprep.mubr.msk.f32.mxu0 %vm6518_vm1, %v6517_v8 }
 0x528   :  { %v791_v49 = vpop.xlane.xlu1 %790 }
 0x529   :  { %v795_v50 = vsub.f32 %v707_v46, %v791_v49 }
 0x52b   :  { %v797_v51 = vmul.f32 1.442695, %v795_v50 }
 0x52d   :  { %6311 = vpow2.f32 %v797_v51 }
 0x537   :  { %v6312_v52 = vpop.eup %6311 }
 0x538   :  { %v801_v53 = vsel %vm216_vm2, %v6312_v52, 0.0 }
 0x539   :  { %802 = vadd.xlane.f32.xlu1 %v801_v53 }
 0x569   :  { %v6729_v54 = vpop.f32.mrb[4].mxu0 }
 0x56a   :  { %v6731_v55 = vpop.f32.mrb[5].mxu0 }
 0x56d   :  { %v785_v56 = vpop.f32.mrb[6].mxu0 }
 0x56e   :  { %v5808_v57 = vpop.f32.mrb[7].mxu0  ;;  %v792_v58 = vsel %vm216_vm2, %v785_v56, -inf }
 0x56f   :  { %793 = vmax.xlane.f32.xlu0 %v792_v58 }
 0x585   :  { %887 = vrot.lane.b32.xlu0 %v6667_v9, %s6523_s19 }
 0x589   :  { %1054 = vrot.lane.b32.xlu0 %v6669_v10, %s6524_s20 }
 0x5c6   :  { %v803_v1 = vpop.xlane.xlu1 %802 }
 0x5fc   :  { %v794_v59 = vpop.xlane.xlu0 %793 }
 0x5fd   :  { %v796_v60 = vsub.f32 %v785_v56, %v794_v59 }
 0x5ff   :  { %v799_v61 = vmul.f32 1.442695, %v796_v60 }
 0x600   :  { %v888_v62 = vpop.permute.xlu0 %887 }
 0x601   :  { %6313 = vpow2.f32 %v799_v61  ;;  %5815 = vmatpush3.msra.mxu0 %v888_v62 }
 0x602   :  { %5824 = vmatprep.subr.mxu0 %v6517_v8  ;;  %6315 = vrcp.f32 %v803_v1 }
 0x604   :  { %v1055_v14 = vpop.permute.xlu0 %1054 }
 0x60b   :  { %v6314_v63 = vpop.eup %6313 }
 0x60c   :  { %v804_v0 = vsel %vm216_vm2, %v6314_v63, 0.0  ;;  %v6316_v4 = vpop.eup %6315 }
 0x60d   :  { %805 = vadd.xlane.f32.xlu1 %v804_v0  ;;  %v808_v7 = vmul.f32 %v6316_v4, %v6312_v52 }
 0x61e   :  { %811 = vrot.lane.b32.xlu1 %v6669_v10, %s6523_s19 }
 0x622   :  { %1056 = vrot.lane.b32.xlu1 %v6669_v10, %s6525_s21 }
 0x626   :  { %1134 = vrot.lane.b32.xlu1 %v6667_v9, %s6525_s21 }
 0x62a   :  { %1132 = vrot.lane.b32.xlu1 %v6667_v9, %s6524_s20 }
 0x69a   :  { %v806_v2 = vpop.xlane.xlu1 %805 }
 0x69b   :  { %6317 = vrcp.f32 %v806_v2 }
 0x69e   :  { %v812_v5 = vpop.permute.xlu1 %811 }
 0x69f   :  { %5810 = vmatpush3.msra.mxu1 %v812_v5 }
 0x6a0   :  { %5812 = vmatmul.mubr.msk.f32.vlgmr.msra.gmra.mrb[8].mxu1 %vm216_vm2, %v808_v7  ;;  %5819 = vmatprep.subr.mxu1 %v6757_v15 }
 0x6a1   :  { %5820 = vmatpush3.msra.mxu1 %v6757_v15 }
 0x6a2   :  { %v1057_v13 = vpop.permute.xlu1 %1056  ;;  %5829 = vmatprep.subr.mxu1 %v6517_v8 }
 0x6a5   :  { %v6318_v11 = vpop.eup %6317 }
 0x6a6   :  { %v810_v12 = vmul.f32 %v6318_v11, %v6314_v63  ;;  %v1135_v18 = vpop.permute.xlu1 %1134 }
 0x6a8   :  { %5817 = vmatmul.mubr.msk.f32.vlgmr.msra.gmra.mrb[8].mxu0 %vm216_vm2, %v810_v12 }
 0x6a9   :  { %5825 = vmatpush3.xpose.msk.msra.mxu0 %vm216_vm2, %v1057_v13  ;;  %5826 = vmatprep.mubr.msk.f32.mxu0 %vm6518_vm1, %v6517_v8 }
 0x6aa   :  { %5834 = vmatprep.subr.mxu0 %v6517_v8  ;;  %v1133_v21 = vpop.permute.xlu1 %1132 }
 0x6ac   :  { %5827 = vmatmul.mubr.msk.f32.vlgmr.msra.gmra.mrb[10].mxu0 %vm216_vm2, %v1055_v14 }
 0x6ad   :  { %5836 = vmatprep.mubr.msk.f32.mxu0 %vm6518_vm1, %v6517_v8 }
 0x773   :  { %v883_v16 = vpop.f32.mrb[8].mxu1 }
 0x774   :  { %v5813_v17 = vpop.f32.mrb[9].mxu1  ;;  %5821 = vmatprep.mubr.msk.f32.mxu1 %vm216_vm2, %v883_v16 }
 0x77b   :  { %v959_v19 = vpop.f32.mrb[8].mxu0 }
 0x77c   :  { %v5818_v20 = vpop.f32.mrb[9].mxu0  ;;  %5822 = vmatmul.mubr.msk.f32.vlgmr.msra.gmra.mrb[10].mxu1 %vm216_vm2, %v959_v19 }
 0x77d   :  { %5830 = vmatpush3.xpose.msk.msra.mxu1 %vm216_vm2, %v1135_v18  ;;  %5831 = vmatprep.mubr.msk.f32.mxu1 %vm6518_vm1, %v6517_v8 }
 0x77e   :  { %5839 = vmatprep.subr.mxu1 %v6517_v8 }
 0x77f   :  { %v1128_v22 = vpop.f32.mrb[10].mxu0 }
 0x780   :  { %v5828_v23 = vpop.f32.mrb[11].mxu0  ;;  %5832 = vmatmul.mubr.msk.f32.vlgmr.msra.gmra.mrb[12].mxu1 %vm216_vm2, %v1133_v21  ;;  %v1210_v24 = vsel %vm216_vm2, %v1128_v22, -inf }
 0x781   :  { %1211 = vmax.xlane.f32.xlu0 %v1210_v24  ;;  %5841 = vmatprep.mubr.msk.f32.mxu1 %vm6518_vm1, %v6517_v8  ;;  %v6828_v24 = vld [vmem:[#allocation10 + $0x98] sm:$0xff] }
 0x80e   :  { %v1212_v25 = vpop.xlane.xlu0 %1211 }
 0x80f   :  { %v1216_v26 = vsub.f32 %v1128_v22, %v1212_v25 }
 0x811   :  { %v1218_v27 = vmul.f32 1.442695, %v1216_v26 }
 0x813   :  { %6319 = vpow2.f32 %v1218_v27 }
 0x81d   :  { %v6320_v28 = vpop.eup %6319 }
 0x81e   :  { %v1222_v29 = vsel %vm216_vm2, %v6320_v28, 0.0 }
 0x81f   :  { %1223 = vadd.xlane.f32.xlu0 %v1222_v29  ;;  %v1898_v29 = vld [vmem:[#allocation7] sm:$0xff] }
 0x84f   :  { %v6773_v31 = vpop.f32.mrb[10].mxu1 }
 0x850   :  { %v6775_v32 = vpop.f32.mrb[11].mxu1 }
 0x853   :  { %v1206_v33 = vpop.f32.mrb[12].mxu1 }
 0x854   :  { %v5833_v34 = vpop.f32.mrb[13].mxu1  ;;  %v1213_v35 = vsel %vm216_vm2, %v1206_v33, -inf }
 0x855   :  { %1214 = vmax.xlane.f32.xlu1 %v1213_v35  ;;  %v1899_v35 = vld [vmem:[#allocation7 + $0x8] sm:$0xff] }
 0x866   :  { %1232 = vrot.lane.b32.xlu1 %v6669_v10, %s6516_s11 }
 0x86a   :  { %1555 = vrot.lane.b32.xlu1 %v6667_v9, %s6526_s22 }
 0x86e   :  { %1553 = vrot.lane.b32.xlu1 %v6667_v9, %s6527_s23 }
 0x872   :  { %1475 = vrot.lane.b32.xlu1 %v6669_v10, %s6527_s23 }
 0x8ac   :  { %v1224_v36 = vpop.xlane.xlu0 %1223 }
 0x8ad   :  { %6321 = vrcp.f32 %v1224_v36 }
 0x8b7   :  { %v6322_v38 = vpop.eup %6321 }
 0x8b8   :  { %v1229_v42 = vmul.f32 %v6322_v38, %v6320_v28 }
 0x8e2   :  { %v1215_v37 = vpop.xlane.xlu1 %1214 }
 0x8e3   :  { %v1217_v39 = vsub.f32 %v1206_v33, %v1215_v37 }
 0x8e5   :  { %v1220_v40 = vmul.f32 1.442695, %v1217_v39 }
 0x8e6   :  { %v1233_v41 = vpop.permute.xlu1 %1232 }
 0x8e7   :  { %6323 = vpow2.f32 %v1220_v40  ;;  %5835 = vmatpush3.msra.mxu0 %v1233_v41 }
 0x8e8   :  { %5837 = vmatmul.mubr.msk.f32.vlgmr.msra.gmra.mrb[12].mxu0 %vm216_vm2, %v1229_v42  ;;  %5844 = vmatprep.subr.mxu0 %v6792_v45 }
 0x8e9   :  { %5845 = vmatpush3.msra.mxu0 %v6792_v45 }
 0x8ea   :  { %5854 = vmatprep.subr.mxu0 %v6517_v8  ;;  %v1556_v48 = vpop.permute.xlu1 %1555 }
 0x8ee   :  { %v1554_v50 = vpop.permute.xlu1 %1553 }
 0x8f1   :  { %v6324_v43 = vpop.eup %6323 }
 0x8f2   :  { %v1225_v44 = vsel %vm216_vm2, %v6324_v43, 0.0  ;;  %v1476_v53 = vpop.permute.xlu1 %1475 }
 0x8f3   :  { %1226 = vadd.xlane.f32.xlu0 %v1225_v44 }
 0x909   :  { %1308 = vrot.lane.b32.xlu0 %v6667_v9, %s6516_s11 }
 0x90d   :  { %1477 = vrot.lane.b32.xlu0 %v6669_v10, %s6526_s22 }
 0x980   :  { %v1227_v46 = vpop.xlane.xlu0 %1226 }
 0x981   :  { %6325 = vrcp.f32 %v1227_v46 }
 0x984   :  { %v1309_v47 = vpop.permute.xlu0 %1308 }
 0x985   :  { %5840 = vmatpush3.msra.mxu1 %v1309_v47 }
 0x986   :  { %5849 = vmatprep.subr.mxu1 %v6517_v8 }
 0x988   :  { %v1478_v52 = vpop.permute.xlu0 %1477 }
 0x98b   :  { %v6326_v49 = vpop.eup %6325 }
 0x98c   :  { %v1231_v51 = vmul.f32 %v6326_v49, %v6324_v43 }
 0x98e   :  { %5842 = vmatmul.mubr.msk.f32.vlgmr.msra.gmra.mrb[14].mxu1 %vm216_vm2, %v1231_v51 }
 0x98f   :  { %5850 = vmatpush3.xpose.msk.msra.mxu1 %vm216_vm2, %v1478_v52  ;;  %5851 = vmatprep.mubr.msk.f32.mxu1 %vm6518_vm1, %v6517_v8 }
 0x990   :  { %5859 = vmatprep.subr.mxu1 %v6517_v8 }
 0x992   :  { %5852 = vmatmul.mubr.msk.f32.vlgmr.msra.gmra.mrb[16].mxu1 %vm216_vm2, %v1476_v53 }
 0x993   :  { %5861 = vmatprep.mubr.msk.f32.mxu1 %vm6518_vm1, %v6517_v8 }
 0x9bb   :  { %v1304_v56 = vpop.f32.mrb[12].mxu0 }
 0x9bc   :  { %v5838_v57 = vpop.f32.mrb[13].mxu0  ;;  %5846 = vmatprep.mubr.msk.f32.mxu0 %vm216_vm2, %v1304_v56 }
 0xa61   :  { %v1380_v58 = vpop.f32.mrb[14].mxu1 }
 0xa62   :  { %v5843_v59 = vpop.f32.mrb[15].mxu1  ;;  %5847 = vmatmul.mubr.msk.f32.vlgmr.msra.gmra.mrb[14].mxu0 %vm216_vm2, %v1380_v58 }
 0xa63   :  { %5855 = vmatpush3.xpose.msk.msra.mxu0 %vm216_vm2, %v1556_v48  ;;  %5856 = vmatprep.mubr.msk.f32.mxu0 %vm6518_vm1, %v6517_v8 }
 0xa64   :  { %5864 = vmatprep.subr.mxu0 %v6517_v8 }
 0xa65   :  { %v1549_v60 = vpop.f32.mrb[16].mxu1 }
 0xa66   :  { %v5853_v61 = vpop.f32.mrb[17].mxu1  ;;  %5857 = vmatmul.mubr.msk.f32.vlgmr.msra.gmra.mrb[16].mxu0 %vm216_vm2, %v1554_v50  ;;  %v1631_v62 = vsel %vm216_vm2, %v1549_v60, -inf }
 0xa67   :  { %1632 = vmax.xlane.f32.xlu1 %v1631_v62  ;;  %5866 = vmatprep.mubr.msk.f32.mxu0 %vm6518_vm1, %v6517_v8 }
 0xaf4   :  { %v1633_v63 = vpop.xlane.xlu1 %1632 }
 0xaf5   :  { %v1637_v0 = vsub.f32 %v1549_v60, %v1633_v63 }
 0xaf7   :  { %v1639_v1 = vmul.f32 1.442695, %v1637_v0 }
 0xaf9   :  { %6327 = vpow2.f32 %v1639_v1 }
 0xb03   :  { %v6328_v2 = vpop.eup %6327 }
 0xb04   :  { %v1643_v4 = vsel %vm216_vm2, %v6328_v2, 0.0 }
 0xb05   :  { %1644 = vadd.xlane.f32.xlu1 %v1643_v4 }
 0xb16   :  { %1653 = vrot.lane.b32.xlu1 %v6669_v10, %s6528_s24 }
 0xb35   :  { %v6819_v5 = vpop.f32.mrb[14].mxu0 }
 0xb36   :  { %v6821_v7 = vpop.f32.mrb[15].mxu0 }
 0xb39   :  { %v1627_v11 = vpop.f32.mrb[16].mxu0 }
 0xb3a   :  { %v5858_v12 = vpop.f32.mrb[17].mxu0  ;;  %v1634_v13 = vsel %vm216_vm2, %v1627_v11, -inf }
 0xb3b   :  { %1635 = vmax.xlane.f32.xlu0 %v1634_v13 }
 0xb92   :  { %v1645_v14 = vpop.xlane.xlu1 %1644 }
 0xb93   :  { %6329 = vrcp.f32 %v1645_v14 }
 0xb96   :  { %v1654_v16 = vpop.permute.xlu1 %1653 }
 0xb97   :  { %5860 = vmatpush3.msra.mxu1 %v1654_v16 }
 0xb98   :  { %5869 = vmatprep.subr.mxu1 %v6828_v24 }
 0xb9d   :  { %v6330_v17 = vpop.eup %6329 }
 0xb9e   :  { %v1650_v18 = vmul.f32 %v6330_v17, %v6328_v2 }
 0xba0   :  { %5862 = vmatmul.mubr.msk.f32.vlgmr.msra.gmra.mrb[18].mxu1 %vm216_vm2, %v1650_v18 }
 0xba1   :  { %5870 = vmatpush3.msra.mxu1 %v6828_v24 }
 0xba2   :  { %5885 = vmatprep.subr.mxu1 %v6517_v8 }
 0xbc8   :  { %v1636_v19 = vpop.xlane.xlu0 %1635 }
 0xbc9   :  { %v1638_v20 = vsub.f32 %v1627_v11, %v1636_v19 }
 0xbcb   :  { %v1641_v21 = vmul.f32 1.442695, %v1638_v20 }
 0xbcd   :  { %6331 = vpow2.f32 %v1641_v21 }
 0xbd7   :  { %v6332_v22 = vpop.eup %6331 }
 0xbd8   :  { %v1646_v23 = vsel %vm216_vm2, %v6332_v22, 0.0 }
 0xbd9   :  { %1647 = vadd.xlane.f32.xlu0 %v1646_v23 }
 0xbef   :  { %1729 = vrot.lane.b32.xlu0 %v6667_v9, %s6528_s24 }
 0xc66   :  { %v1648_v25 = vpop.xlane.xlu0 %1647 }
 0xc67   :  { %6333 = vrcp.f32 %v1648_v25 }
 0xc6a   :  { %v1730_v26 = vpop.permute.xlu0 %1729 }
 0xc6b   :  { %5865 = vmatpush3.msra.mxu0 %v1730_v26 }
 0xc6c   :  { %6124 = vmatprep.subr.bf16.mxu0 %v6651_v3 }
 0xc71   :  { %v6334_v27 = vpop.eup %6333 }
 0xc72   :  { %v1652_v28 = vmul.f32 %v6334_v27, %v6332_v22 }
 0xc73   :  { %v1725_v33 = vpop.f32.mrb[18].mxu1 }
 0xc74   :  { %v5863_v34 = vpop.f32.mrb[19].mxu1  ;;  %5867 = vmatmul.mubr.msk.f32.vlgmr.msra.gmra.mrb[18].mxu0 %vm216_vm2, %v1652_v28  ;;  %5871 = vmatprep.mubr.msk.f32.mxu1 %vm216_vm2, %v1725_v33 }
 0xc75   :  { %6126 = vmatpush3.bf16.msra.mxu0 %v6651_v3  ;;  %5882 = vmatprep.mubr.msk.f32.mxu0 %vm121_vm0, %v1898_v29 }
 0xc76   :  { %6128 = vmatprep.subr.bf16.mxu0 %v6653_v6 }
 0xc79   :  { %6130 = vmatpush3.bf16.msra.mxu0 %v6653_v6 }
 0xc7a   :  { %5895 = vmatprep.subr.mxu0 %v6517_v8 }
 0xc7c   :  { %5883 = vmatmul.mubr.msk.f32.vlgmr.msra.gmra.mrb[20].mxu0 %vm121_vm0, %v1899_v35 }
 0xc7d   :  { %5897 = vmatprep.mubr.msk.f32.mxu0 %vm6518_vm1, %v6517_v8 }
 0xd47   :  { %v1801_v36 = vpop.f32.mrb[18].mxu0 }
 0xd48   :  { %v5868_v37 = vpop.f32.mrb[19].mxu0  ;;  %5872 = vmatmul.mubr.msk.f32.vlgmr.msra.gmra.mrb[20].mxu1 %vm216_vm2, %v1801_v36 }
 0xd49   :  { %5887 = vmatprep.mubr.msk.f32.mxu1 %vm6518_vm1, %v6517_v8 }
 0xd4f   :  { %v6847_v38 = vpop.f32.mrb[20].mxu0 }
 0xd50   :  { %2061 = vrot.lane.b32.xlu1 %v6847_v38, %s6519_s5  ;;  %v6851_v39 = vpop.f32.mrb[21].mxu0 }
 0xd51   :  { %1984 = vrot.lane.b32.xlu0 %v6851_v39, %s6519_s5 }
 0xdc2   :  { %v2062_v41 = vpop.permute.xlu1 %2061 }
 0xdc3   :  { %v1985_v40 = vpop.permute.xlu0 %1984 }
 0xdc4   :  { %5886 = vmatpush3.xpose.msk.msra.mxu1 %vm216_vm2, %v1985_v40 }
 0xdc5   :  { %5890 = vmatprep.subr.mxu1 %v6517_v8 }
 0xdc7   :  { %5888 = vmatmul.mubr.msk.f32.vlgmr.msra.gmra.mrb[22].mxu1 %vm216_vm2, %v6851_v39 }
 0xdc8   :  { %5891 = vmatpush3.xpose.msk.msra.mxu1 %vm216_vm2, %v2062_v41  ;;  %5892 = vmatprep.mubr.msk.f32.mxu1 %vm6518_vm1, %v6517_v8 }
 0xdc9   :  { %5900 = vmatprep.subr.mxu1 %v6517_v8 }
 0xdcb   :  { %5893 = vmatmul.mubr.msk.f32.vlgmr.msra.gmra.mrb[24].mxu1 %vm216_vm2, %v6847_v38 }
 0xdcc   :  { %5902 = vmatprep.mubr.msk.f32.mxu1 %vm6518_vm1, %v6517_v8 }
 0xe1b   :  { %v6867_v42 = vpop.f32.mrb[20].mxu1 }
 0xe1c   :  { %v6869_v43 = vpop.f32.mrb[21].mxu1 }
 0xe9a   :  { %v2056_v44 = vpop.f32.mrb[22].mxu1 }
 0xe9b   :  { %v5889_v46 = vpop.f32.mrb[23].mxu1  ;;  %v2137_v47 = vsel %vm216_vm2, %v2056_v44, -inf }
 0xe9c   :  { %2138 = vmax.xlane.f32.xlu0 %v2137_v47 }
 0xe9e   :  { %v2133_v48 = vpop.f32.mrb[24].mxu1 }
 0xe9f   :  { %v5894_v49 = vpop.f32.mrb[25].mxu1  ;;  %v2140_v50 = vsel %vm216_vm2, %v2133_v48, -inf }
 0xea0   :  { %2141 = vmax.xlane.f32.xlu1 %v2140_v50 }
 0xeb1   :  { %2159 = vrot.lane.b32.xlu1 %v6851_v39, %s6520_s15 }
 0xeb5   :  { %2404 = vrot.lane.b32.xlu1 %v6851_v39, %s6522_s17 }
 0xeb9   :  { %2482 = vrot.lane.b32.xlu1 %v6847_v38, %s6522_s17 }
 0xebd   :  { %2480 = vrot.lane.b32.xlu1 %v6847_v38, %s6521_s16 }
 0xf29   :  { %v2139_v51 = vpop.xlane.xlu0 %2138 }
 0xf2a   :  { %v2143_v52 = vsub.f32 %v2056_v44, %v2139_v51 }
 0xf2c   :  { %v2145_v53 = vmul.f32 1.442695, %v2143_v52 }
 0xf2d   :  { %v2142_v56 = vpop.xlane.xlu1 %2141 }
 0xf2e   :  { %6335 = vpow2.f32 %v2145_v53  ;;  %v2144_v57 = vsub.f32 %v2133_v48, %v2142_v56 }
 0xf30   :  { %v2147_v58 = vmul.f32 1.442695, %v2144_v57 }
 0xf31   :  { %v2160_v59 = vpop.permute.xlu1 %2159 }
 0xf32   :  { %6337 = vpow2.f32 %v2147_v58  ;;  %5896 = vmatpush3.msra.mxu0 %v2160_v59 }
 0xf33   :  { %5905 = vmatprep.subr.mxu0 %v6703_v30 }
 0xf35   :  { %v2405_v14 = vpop.permute.xlu1 %2404 }
 0xf38   :  { %v6336_v60 = vpop.eup %6335 }
 0xf39   :  { %v2149_v61 = vsel %vm216_vm2, %v6336_v60, 0.0  ;;  %v2483_v18 = vpop.permute.xlu1 %2482 }
 0xf3a   :  { %2150 = vadd.xlane.f32.xlu0 %v2149_v61 }
 0xf3c   :  { %v6338_v62 = vpop.eup %6337 }
 0xf3d   :  { %v2152_v63 = vsel %vm216_vm2, %v6338_v62, 0.0  ;;  %v2481_v21 = vpop.permute.xlu1 %2480 }
 0xf3e   :  { %2153 = vadd.xlane.f32.xlu0 %v2152_v63 }
 0xf54   :  { %2235 = vrot.lane.b32.xlu0 %v6847_v38, %s6520_s15 }
 0xf58   :  { %2402 = vrot.lane.b32.xlu0 %v6851_v39, %s6521_s16 }
 0xfc7   :  { %v2151_v0 = vpop.xlane.xlu0 %2150 }
 0xfc8   :  { %6339 = vrcp.f32 %v2151_v0 }
 0xfcb   :  { %v2154_v1 = vpop.xlane.xlu0 %2153 }
 0xfcc   :  { %6341 = vrcp.f32 %v2154_v1 }
 0xfcf   :  { %v2236_v2 = vpop.permute.xlu0 %2235 }
 0xfd0   :  { %5901 = vmatpush3.msra.mxu1 %v2236_v2 }
 0xfd1   :  { %5910 = vmatprep.subr.mxu1 %v6517_v8 }
 0xfd2   :  { %v6340_v4 = vpop.eup %6339 }
 0xfd3   :  { %v2156_v11 = vmul.f32 %v6340_v4, %v6336_v60  ;;  %v2403_v16 = vpop.permute.xlu0 %2402 }
 0xfd5   :  { %5898 = vmatmul.mubr.msk.f32.vlgmr.msra.gmra.mrb[22].mxu0 %vm216_vm2, %v2156_v11 }
 0xfd6   :  { %v6342_v12 = vpop.eup %6341  ;;  %5906 = vmatpush3.msra.mxu0 %v6703_v30 }
 0xfd7   :  { %v2158_v13 = vmul.f32 %v6342_v12, %v6338_v62  ;;  %5915 = vmatprep.subr.mxu0 %v6517_v8 }
 0xfd9   :  { %5903 = vmatmul.mubr.msk.f32.vlgmr.msra.gmra.mrb[26].mxu1 %vm216_vm2, %v2158_v13 }
 0xfda   :  { %5911 = vmatpush3.xpose.msk.msra.mxu1 %vm216_vm2, %v2405_v14  ;;  %5912 = vmatprep.mubr.msk.f32.mxu1 %vm6518_vm1, %v6517_v8 }
 0xfdb   :  { %5920 = vmatprep.subr.mxu1 %v6517_v8 }
 0xfdd   :  { %5913 = vmatmul.mubr.msk.f32.vlgmr.msra.gmra.mrb[28].mxu1 %vm216_vm2, %v2403_v16 }
 0xfde   :  { %5922 = vmatprep.mubr.msk.f32.mxu1 %vm6518_vm1, %v6517_v8 }
0x10a8   :  { %v2231_v30 = vpop.f32.mrb[22].mxu0 }
0x10a9   :  { %v5899_v17 = vpop.f32.mrb[23].mxu0  ;;  %5907 = vmatprep.mubr.msk.f32.mxu0 %vm216_vm2, %v2231_v30 }
0x10ac   :  { %v2307_v19 = vpop.f32.mrb[26].mxu1 }
0x10ad   :  { %v5904_v20 = vpop.f32.mrb[27].mxu1  ;;  %5908 = vmatmul.mubr.msk.f32.vlgmr.msra.gmra.mrb[24].mxu0 %vm216_vm2, %v2307_v19 }
0x10ae   :  { %5916 = vmatpush3.xpose.msk.msra.mxu0 %vm216_vm2, %v2483_v18  ;;  %5917 = vmatprep.mubr.msk.f32.mxu0 %vm6518_vm1, %v6517_v8 }
0x10af   :  { %5925 = vmatprep.subr.mxu0 %v6517_v8 }
0x10b0   :  { %v2476_v22 = vpop.f32.mrb[28].mxu1 }
0x10b1   :  { %v5914_v23 = vpop.f32.mrb[29].mxu1  ;;  %5918 = vmatmul.mubr.msk.f32.vlgmr.msra.gmra.mrb[26].mxu0 %vm216_vm2, %v2481_v21  ;;  %v2558_v25 = vsel %vm216_vm2, %v2476_v22, -inf }
0x10b2   :  { %2559 = vmax.xlane.f32.xlu0 %v2558_v25  ;;  %5927 = vmatprep.mubr.msk.f32.mxu0 %vm6518_vm1, %v6517_v8 }
0x113f   :  { %v2560_v26 = vpop.xlane.xlu0 %2559 }
0x1140   :  { %v2564_v27 = vsub.f32 %v2476_v22, %v2560_v26 }
0x1142   :  { %v2566_v28 = vmul.f32 1.442695, %v2564_v27 }
0x1144   :  { %6343 = vpow2.f32 %v2566_v28 }
0x114e   :  { %v6344_v29 = vpop.eup %6343 }
0x114f   :  { %v2570_v33 = vsel %vm216_vm2, %v6344_v29, 0.0 }
0x1150   :  { %2571 = vadd.xlane.f32.xlu0 %v2570_v33 }
0x1180   :  { %v6911_v34 = vpop.f32.mrb[24].mxu0 }
0x1181   :  { %v6913_v35 = vpop.f32.mrb[25].mxu0 }
0x1184   :  { %v2554_v36 = vpop.f32.mrb[26].mxu0 }
0x1185   :  { %v5919_v37 = vpop.f32.mrb[27].mxu0  ;;  %v2561_v40 = vsel %vm216_vm2, %v2554_v36, -inf }
0x1186   :  { %2562 = vmax.xlane.f32.xlu1 %v2561_v40 }
0x1197   :  { %2580 = vrot.lane.b32.xlu1 %v6851_v39, %s6523_s19 }
0x119b   :  { %2825 = vrot.lane.b32.xlu1 %v6851_v39, %s6525_s21 }
0x119f   :  { %2903 = vrot.lane.b32.xlu1 %v6847_v38, %s6525_s21 }
0x11a3   :  { %2901 = vrot.lane.b32.xlu1 %v6847_v38, %s6524_s20 }
0x11dd   :  { %v2572_v41 = vpop.xlane.xlu0 %2571 }
0x11de   :  { %6345 = vrcp.f32 %v2572_v41 }
0x11e8   :  { %v6346_v46 = vpop.eup %6345 }
0x11e9   :  { %v2577_v49 = vmul.f32 %v6346_v46, %v6344_v29 }
0x1213   :  { %v2563_v44 = vpop.xlane.xlu1 %2562 }
0x1214   :  { %v2565_v47 = vsub.f32 %v2554_v36, %v2563_v44 }
0x1216   :  { %v2568_v48 = vmul.f32 1.442695, %v2565_v47 }
0x1217   :  { %v2581_v50 = vpop.permute.xlu1 %2580 }
0x1218   :  { %6347 = vpow2.f32 %v2568_v48  ;;  %5921 = vmatpush3.msra.mxu1 %v2581_v50 }
0x1219   :  { %5923 = vmatmul.mubr.msk.f32.vlgmr.msra.gmra.mrb[30].mxu1 %vm216_vm2, %v2577_v49  ;;  %5930 = vmatprep.subr.mxu1 %v6757_v15 }
0x121a   :  { %5931 = vmatpush3.msra.mxu1 %v6757_v15 }
0x121b   :  { %5940 = vmatprep.subr.mxu1 %v6517_v8  ;;  %v2826_v59 = vpop.permute.xlu1 %2825 }
0x121f   :  { %v2904_v63 = vpop.permute.xlu1 %2903 }
0x1222   :  { %v6348_v51 = vpop.eup %6347 }
0x1223   :  { %v2573_v52 = vsel %vm216_vm2, %v6348_v51, 0.0  ;;  %v2902_v2 = vpop.permute.xlu1 %2901 }
0x1224   :  { %2574 = vadd.xlane.f32.xlu0 %v2573_v52 }
0x123a   :  { %2656 = vrot.lane.b32.xlu0 %v6847_v38, %s6523_s19 }
0x123e   :  { %2823 = vrot.lane.b32.xlu0 %v6851_v39, %s6524_s20 }
0x12b1   :  { %v2575_v53 = vpop.xlane.xlu0 %2574 }
0x12b2   :  { %6349 = vrcp.f32 %v2575_v53 }
0x12b5   :  { %v2657_v56 = vpop.permute.xlu0 %2656 }
0x12b6   :  { %5926 = vmatpush3.msra.mxu0 %v2657_v56 }
0x12b7   :  { %5935 = vmatprep.subr.mxu0 %v6517_v8 }
0x12b9   :  { %v2824_v60 = vpop.permute.xlu0 %2823 }
0x12bc   :  { %v6350_v57 = vpop.eup %6349 }
0x12bd   :  { %v2579_v58 = vmul.f32 %v6350_v57, %v6348_v51 }
0x12bf   :  { %5928 = vmatmul.mubr.msk.f32.vlgmr.msra.gmra.mrb[28].mxu0 %vm216_vm2, %v2579_v58 }
0x12c0   :  { %5936 = vmatpush3.xpose.msk.msra.mxu0 %vm216_vm2, %v2826_v59  ;;  %5937 = vmatprep.mubr.msk.f32.mxu0 %vm6518_vm1, %v6517_v8 }
0x12c1   :  { %5945 = vmatprep.subr.mxu0 %v6517_v8 }
0x12c3   :  { %5938 = vmatmul.mubr.msk.f32.vlgmr.msra.gmra.mrb[30].mxu0 %vm216_vm2, %v2824_v60 }
0x12c4   :  { %5947 = vmatprep.mubr.msk.f32.mxu0 %vm6518_vm1, %v6517_v8 }
0x12ec   :  { %v2652_v61 = vpop.f32.mrb[30].mxu1 }
0x12ed   :  { %v5924_v62 = vpop.f32.mrb[31].mxu1  ;;  %5932 = vmatprep.mubr.msk.f32.mxu1 %vm216_vm2, %v2652_v61 }
0x1392   :  { %v2728_v0 = vpop.f32.mrb[28].mxu0 }
0x1393   :  { %v5929_v1 = vpop.f32.mrb[29].mxu0  ;;  %5933 = vmatmul.mubr.msk.f32.vlgmr.msra.gmra.mrb[32].mxu1 %vm216_vm2, %v2728_v0 }
0x1394   :  { %5941 = vmatpush3.xpose.msk.msra.mxu1 %vm216_vm2, %v2904_v63  ;;  %5942 = vmatprep.mubr.msk.f32.mxu1 %vm6518_vm1, %v6517_v8  ;;  %v5490_v1 = vld [vmem:[%s7341_s6] ss:$0 sm:$0xff] }
0x1395   :  { %5950 = vmatprep.subr.mxu1 %v6517_v8 }
0x1396   :  { %v2897_v4 = vpop.f32.mrb[30].mxu0 }
0x1397   :  { %v5939_v11 = vpop.f32.mrb[31].mxu0  ;;  %5943 = vmatmul.mubr.msk.f32.vlgmr.msra.gmra.mrb[34].mxu1 %vm216_vm2, %v2902_v2  ;;  %v2979_v12 = vsel %vm216_vm2, %v2897_v4, -inf }
0x1398   :  { %2980 = vmax.xlane.f32.xlu0 %v2979_v12  ;;  %5952 = vmatprep.mubr.msk.f32.mxu1 %vm6518_vm1, %v6517_v8 }
0x1425   :  { %v2981_v13 = vpop.xlane.xlu0 %2980 }
0x1426   :  { %v2985_v14 = vsub.f32 %v2897_v4, %v2981_v13 }
0x1428   :  { %v2987_v16 = vmul.f32 1.442695, %v2985_v14 }
0x142a   :  { %6351 = vpow2.f32 %v2987_v16 }
0x1434   :  { %v6352_v30 = vpop.eup %6351 }
0x1435   :  { %v2991_v17 = vsel %vm216_vm2, %v6352_v30, 0.0 }
0x1436   :  { %2992 = vadd.xlane.f32.xlu0 %v2991_v17 }
0x1466   :  { %v6953_v18 = vpop.f32.mrb[32].mxu1 }
0x1467   :  { %v6955_v19 = vpop.f32.mrb[33].mxu1 }
0x146a   :  { %v2975_v20 = vpop.f32.mrb[34].mxu1 }
0x146b   :  { %v5944_v21 = vpop.f32.mrb[35].mxu1  ;;  %v2982_v22 = vsel %vm216_vm2, %v2975_v20, -inf }
0x146c   :  { %2983 = vmax.xlane.f32.xlu1 %v2982_v22 }
0x147d   :  { %3001 = vrot.lane.b32.xlu1 %v6851_v39, %s6516_s11 }
0x1481   :  { %3324 = vrot.lane.b32.xlu1 %v6847_v38, %s6526_s22 }
0x1485   :  { %3322 = vrot.lane.b32.xlu1 %v6847_v38, %s6527_s23 }
0x1489   :  { %3244 = vrot.lane.b32.xlu1 %v6851_v39, %s6527_s23 }
0x14c3   :  { %v2993_v23 = vpop.xlane.xlu0 %2992 }
0x14c4   :  { %6353 = vrcp.f32 %v2993_v23 }
0x14ce   :  { %v6354_v26 = vpop.eup %6353 }
0x14cf   :  { %v2998_v29 = vmul.f32 %v6354_v26, %v6352_v30  ;;  %v6529_v26 = vmov 0.0|0.0  }
0x14f9   :  { %v2984_v25 = vpop.xlane.xlu1 %2983 }
0x14fa   :  { %v2986_v27 = vsub.f32 %v2975_v20, %v2984_v25 }
0x14fc   :  { %v2989_v28 = vmul.f32 1.442695, %v2986_v27 }
0x14fd   :  { %v3002_v33 = vpop.permute.xlu1 %3001 }
0x14fe   :  { %6355 = vpow2.f32 %v2989_v28  ;;  %5946 = vmatpush3.msra.mxu0 %v3002_v33 }
0x14ff   :  { %5948 = vmatmul.mubr.msk.f32.vlgmr.msra.gmra.mrb[32].mxu0 %vm216_vm2, %v2998_v29  ;;  %5955 = vmatprep.subr.mxu0 %v6792_v45 }
0x1500   :  { %5956 = vmatpush3.msra.mxu0 %v6792_v45 }
0x1501   :  { %5965 = vmatprep.subr.mxu0 %v6517_v8  ;;  %v3325_v44 = vpop.permute.xlu1 %3324 }
0x1505   :  { %v3323_v47 = vpop.permute.xlu1 %3322 }
0x1508   :  { %v6356_v36 = vpop.eup %6355 }
0x1509   :  { %v2994_v37 = vsel %vm216_vm2, %v6356_v36, 0.0  ;;  %v3245_v50 = vpop.permute.xlu1 %3244 }
0x150a   :  { %2995 = vadd.xlane.f32.xlu0 %v2994_v37 }
0x1520   :  { %3077 = vrot.lane.b32.xlu0 %v6847_v38, %s6516_s11  ;;  %s6478_s11 = scalar_lea.vmem %s5478_s2, 96 }
0x1521   :  { %p6479_p12 = scmp.ne.s32.totalorder %s5478_s2, %s6478_s11  ;;  %p6484_p0 = scmp.lt.s32.totalorder %s6478_s11, %s6478_s11 }
0x1523   :  { %p6485_p1 = por %p6484_p0, %p6483_p13 }
0x1524   :  { %3246 = vrot.lane.b32.xlu0 %v6851_v39, %s6526_s22 }
0x1525   :  { %p6486_p2 = pnand %p6485_p1, %p6479_p12 }
0x1597   :  { %v2996_v40 = vpop.xlane.xlu0 %2995 }
0x1598   :  { %6357 = vrcp.f32 %v2996_v40  ;;  %v3667_v40 = vld [vmem:[#allocation2] sm:$0x3] }
0x159b   :  { %v3078_v41 = vpop.permute.xlu0 %3077 }
0x159c   :  { %5951 = vmatpush3.msra.mxu1 %v3078_v41  ;;  %v7023_v41 = vld [vmem:[#allocation10 + $0x8] sm:$0xff] }
0x159d   :  { %5960 = vmatprep.subr.mxu1 %v6517_v8 }
0x159f   :  { %v3247_v49 = vpop.permute.xlu0 %3246 }
0x15a2   :  { %v6358_v46 = vpop.eup %6357 }
0x15a3   :  { %v3000_v48 = vmul.f32 %v6358_v46, %v6356_v36 }
0x15a5   :  { %5953 = vmatmul.mubr.msk.f32.vlgmr.msra.gmra.mrb[36].mxu1 %vm216_vm2, %v3000_v48 }
0x15a6   :  { %5961 = vmatpush3.xpose.msk.msra.mxu1 %vm216_vm2, %v3247_v49  ;;  %5962 = vmatprep.mubr.msk.f32.mxu1 %vm6518_vm1, %v6517_v8 }
0x15a7   :  { %5970 = vmatprep.subr.mxu1 %v6517_v8 }
0x15a9   :  { %5963 = vmatmul.mubr.msk.f32.vlgmr.msra.gmra.mrb[38].mxu1 %vm216_vm2, %v3245_v50 }
0x15aa   :  { %5972 = vmatprep.mubr.msk.f32.mxu1 %vm6518_vm1, %v6517_v8 }
0x15d2   :  { %v3073_v51 = vpop.f32.mrb[32].mxu0 }
0x15d3   :  { %v5949_v52 = vpop.f32.mrb[33].mxu0  ;;  %5957 = vmatprep.mubr.msk.f32.mxu0 %vm216_vm2, %v3073_v51 }
0x15d4   :  { %v97_v52 = vld [vmem:[#allocation10 + $0x20] sm:$0xff] }
0x1678   :  { %v3149_v53 = vpop.f32.mrb[36].mxu1 }
0x1679   :  { %v5954_v56 = vpop.f32.mrb[37].mxu1  ;;  %5958 = vmatmul.mubr.msk.f32.vlgmr.msra.gmra.mrb[34].mxu0 %vm216_vm2, %v3149_v53  ;;  %v98_v53 = vld [vmem:[#allocation10 + $0x28] sm:$0xff] }
0x167a   :  { %5966 = vmatpush3.xpose.msk.msra.mxu0 %vm216_vm2, %v3325_v44  ;;  %5967 = vmatprep.mubr.msk.f32.mxu0 %vm6518_vm1, %v6517_v8  ;;  %v6138_v44 = vpack.c.bf16 %v6757_v15, %v7023_v41  ;;  %v96_v56 = vld [vmem:[#allocation10 + $0x18] sm:$0xff] }
0x167b   :  { %5975 = vmatprep.subr.mxu0 %v6517_v8 }
0x167c   :  { %v3318_v57 = vpop.f32.mrb[38].mxu1 }
0x167d   :  { %v5964_v58 = vpop.f32.mrb[39].mxu1  ;;  %5968 = vmatmul.mubr.msk.f32.vlgmr.msra.gmra.mrb[36].mxu0 %vm216_vm2, %v3323_v47  ;;  %v3400_v59 = vsel %vm216_vm2, %v3318_v57, -inf }
0x167e   :  { %3401 = vmax.xlane.f32.xlu1 %v3400_v59  ;;  %5977 = vmatprep.mubr.msk.f32.mxu0 %vm6518_vm1, %v6517_v8  ;;  %v102_v58 = vld [vmem:[#allocation10 + $0x48] sm:$0xff] }
0x167f   :  { %v6258_v59 = vpack.i.bf16 %v102_v58, %v96_v56 }
0x170b   :  { %v3402_v60 = vpop.xlane.xlu1 %3401 }
0x170c   :  { %v3406_v61 = vsub.f32 %v3318_v57, %v3402_v60  ;;  %v6248_v57 = vpack.i.bf16 %v98_v53, %v97_v52  ;;  %v115_v60 = vld [vmem:[#allocation10 + $0xb0] sm:$0xff] }
0x170e   :  { %v3408_v62 = vmul.f32 1.442695, %v3406_v61  ;;  %v116_v61 = vld [vmem:[#allocation10 + $0xb8] sm:$0xff] }
0x1710   :  { %6359 = vpow2.f32 %v3408_v62  ;;  %v6268_v62 = vpack.i.bf16 %v116_v61, %v115_v60 }
0x171a   :  { %v6360_v63 = vpop.eup %6359 }
0x171b   :  { %v3412_v0 = vsel %vm216_vm2, %v6360_v63, 0.0 }
0x171c   :  { %3413 = vadd.xlane.f32.xlu1 %v3412_v0  ;;  %v104_v0 = vld [vmem:[#allocation10 + $0x58] sm:$0xff] }
0x172d   :  { %3422 = vrot.lane.b32.xlu1 %v6851_v39, %s6528_s24 }
0x1731   :  { %208 = vrot.lane.b32.xlu1 %v5490_v1, %s6519_s5 }
0x1735   :  { %6249 = vrot.lane.b32.xlu1 %v6248_v57, %s6519_s5 }
0x1739   :  { %6259 = vrot.lane.b32.xlu1 %v6258_v59, %s6519_s5 }
0x173d   :  { %6269 = vrot.lane.b32.xlu1 %v6268_v62, %s6519_s5 }
0x174c   :  { %v7001_v2 = vpop.f32.mrb[34].mxu0 }
0x174d   :  { %v7003_v4 = vpop.f32.mrb[35].mxu0 }
0x1750   :  { %v3396_v11 = vpop.f32.mrb[36].mxu0 }
0x1751   :  { %v5969_v12 = vpop.f32.mrb[37].mxu0  ;;  %v3403_v13 = vsel %vm216_vm2, %v3396_v11, -inf }
0x1752   :  { %3404 = vmax.xlane.f32.xlu0 %v3403_v13  ;;  %v109_v13 = vld [vmem:[#allocation10 + $0x80] sm:$0xff] }
0x17a9   :  { %v3414_v14 = vpop.xlane.xlu1 %3413 }
0x17aa   :  { %6361 = vrcp.f32 %v3414_v14  ;;  %v110_v14 = vld [vmem:[#allocation10 + $0x88] sm:$0xff] }
0x17ad   :  { %v3423_v16 = vpop.permute.xlu1 %3422 }
0x17ae   :  { %5971 = vmatpush3.msra.mxu1 %v3423_v16  ;;  %v6263_v16 = vpack.i.bf16 %v110_v14, %v109_v13 }
0x17af   :  { %5980 = vmatprep.subr.mxu1 %v6828_v24 }
0x17b4   :  { %v6362_v30 = vpop.eup %6361 }
0x17b5   :  { %v3419_v17 = vmul.f32 %v6362_v30, %v6360_v63  ;;  %v103_v63 = vld [vmem:[#allocation10 + $0x50] sm:$0xff]  ;;  %v108_v30 = vld [vmem:[#allocation10 + $0x78] sm:$0xff] }
0x17b6   :  { %v6253_v12 = vpack.i.bf16 %v104_v0, %v103_v63 }
0x17b7   :  { %5973 = vmatmul.mubr.msk.f32.vlgmr.msra.gmra.mrb[40].mxu1 %vm216_vm2, %v3419_v17  ;;  %v114_v17 = vld [vmem:[#allocation10 + $0xa8] sm:$0xff] }
0x17b8   :  { %5981 = vmatpush3.msra.mxu1 %v6828_v24 }
0x17b9   :  { %6137 = vmatprep.subr.bf16.mxu1 %v6529_v26 }
0x17df   :  { %v3405_v20 = vpop.xlane.xlu0 %3404 }
0x17e0   :  { %v3407_v21 = vsub.f32 %v3396_v11, %v3405_v20  ;;  %v6273_v20 = vpack.i.bf16 %v114_v17, %v108_v30 }
0x17e2   :  { %v3410_v22 = vmul.f32 1.442695, %v3407_v21  ;;  %v3824_v21 = vlaneseq }
0x17e4   :  { %6363 = vpow2.f32 %v3410_v22  ;;  %v7049_v22 = vshrl.u32 %v3824_v21, 7 }
0x17e6   :  { %v3838_v13 = vsub.s32 3, %v7049_v22 }
0x17ee   :  { %v6364_v23 = vpop.eup %6363 }
0x17ef   :  { %v3415_v25 = vsel %vm216_vm2, %v6364_v23, 0.0 }
0x17f0   :  { %3416 = vadd.xlane.f32.xlu0 %v3415_v25  ;;  %v7057_v25 = vld [vmem:[%s7341_s6] sm:$0x1f]  ;;  %s6530_s6 = smov 32  }
0x17f1   :  { %v3839_v14 = vrot.slane %v7057_v25, %v3838_v13 }
0x1806   :  { %3498 = vrot.lane.b32.xlu0 %v6847_v38, %s6528_s24 }
0x187d   :  { %v3417_v27 = vpop.xlane.xlu0 %3416 }
0x187e   :  { %6365 = vrcp.f32 %v3417_v27 }
0x1881   :  { %v3499_v28 = vpop.permute.xlu0 %3498 }
0x1882   :  { %5976 = vmatpush3.msra.mxu0 %v3499_v28 }
0x1883   :  { %6131 = vmatprep.subr.bf16.mxu0 %v6529_v26 }
0x1888   :  { %v6366_v29 = vpop.eup %6365 }
0x1889   :  { %v3421_v33 = vmul.f32 %v6366_v29, %v6364_v23  ;;  %v3834_v23 = vsub.s32 2, %v7049_v22 }
0x188a   :  { %v3494_v36 = vpop.f32.mrb[40].mxu1 }
0x188b   :  { %v5974_v37 = vpop.f32.mrb[41].mxu1  ;;  %5978 = vmatmul.mubr.msk.f32.vlgmr.msra.gmra.mrb[38].mxu0 %vm216_vm2, %v3421_v33  ;;  %5982 = vmatprep.mubr.msk.f32.mxu1 %vm216_vm2, %v3494_v36 }
0x188c   :  { %6133 = vmatpush3.bf16.msra.mxu0 %v6651_v3  ;;  %5993 = vmatprep.mubr.msk.f32.mxu0 %vm6518_vm1, %v6517_v8  ;;  %v6141_v3 = vpack.c.bf16 %v6828_v24, %v6792_v45 }
0x188d   :  { %6134 = vmatprep.subr.bf16.mxu0 %v6529_v26 }
0x1890   :  { %6136 = vmatpush3.bf16.msra.mxu0 %v6653_v6 }
0x1893   :  { %5994 = vmatmul.mubr.msk.f32.vlgmr.msra.gmra.mrb[40].mxu0 %vm121_vm0, %v3667_v40 }
0x1894   :  { %4024 = vmatprep.mubr.f32.mxu0 %v6517_v8 }
0x195e   :  { %v3570_v46 = vpop.f32.mrb[38].mxu0 }
0x195f   :  { %v5979_v47 = vpop.f32.mrb[39].mxu0  ;;  %5983 = vmatmul.mubr.msk.f32.vlgmr.msra.gmra.mrb[42].mxu1 %vm216_vm2, %v3570_v46 }
0x1960   :  { %6139 = vmatpush3.bf16.msra.mxu1 %v6138_v44  ;;  %6004 = vmatprep.mubr.msk.f32.mxu1 %vm6518_vm1, %v6517_v8 }
0x1961   :  { %6140 = vmatprep.subr.bf16.mxu1 %v6529_v26 }
0x1964   :  { %6142 = vmatpush3.bf16.msra.mxu1 %v6141_v3 }
0x1966   :  { %v3737_v6 = vpop.f32.mrb[40].mxu0 }
0x1967   :  { %3743 = vrot.lane.b32.xlu0 %v3737_v6, %s6520_s15  ;;  %v5995_v48 = vpop.f32.mrb[41].mxu0 }
0x19d9   :  { %v3744_v49 = vpop.permute.xlu0 %3743 }
0x19da   :  { %6005 = vmatmul.mubr.msk.f32.vlgmr.msra.gmra.mrb[44].mxu1 %vm121_vm0, %v3744_v49 }
0x19db   :  { %4095 = vmatprep.mubr.f32.mxu1 %v6517_v8 }
0x1a32   :  { %v5984_v50 = vpop.f32.mrb[42].mxu1 }
0x1a33   :  { %v7036_v51 = vpop.f32.mrb[43].mxu1 }
0x1aad   :  { %v3813_v1 = vpop.f32.mrb[44].mxu1 }
0x1aae   :  { %3818 = vrot.lane.b32.xlu0 %v3813_v1, %s6519_s5  ;;  %v6006_v11 = vpop.f32.mrb[45].mxu1 }
0x1ab2   :  { %6254 = vrot.lane.b32.xlu0 %v6253_v12, %s6519_s5 }
0x1ab6   :  { %6264 = vrot.lane.b32.xlu0 %v6263_v16, %s6519_s5 }
0x1aba   :  { %6274 = vrot.lane.b32.xlu0 %v6273_v20, %s6519_s5 }
0x1abe   :  { %627 = vrot.lane.b32.xlu0 %v6729_v54, %s6519_s5  ;;  %v3835_v54 = vrot.slane %v7057_v25, %v3834_v23 }
0x1ac2   :  { %1048 = vrot.lane.b32.xlu0 %v6773_v31, %s6519_s5  ;;  %v3842_v31 = vsub.s32 4, %v7049_v22 }
0x1ac6   :  { %1469 = vrot.lane.b32.xlu0 %v6819_v5, %s6519_s5  ;;  %v3843_v5 = vrot.slane %v7057_v25, %v3842_v31  ;;  %v101_v31 = vld [vmem:[#allocation10 + $0x40] sm:$0xff] }
0x1aca   :  { %1890 = vrot.lane.b32.xlu0 %v6867_v42, %s6519_s5  ;;  %v6283_v42 = vpack.i.bf16 %v6757_v15, %v7023_v41 }
0x1ace   :  { %3944 = vrot.lane.b32.xlu0 %v3835_v54, %s6519_s5  ;;  %v95_v54 = vld [vmem:[#allocation10 + $0x10] sm:$0xff] }
0x1ad2   :  { %2396 = vrot.lane.b32.xlu0 %v6911_v34, %s6519_s5  ;;  %v6293_v34 = vpack.i.bf16 %v6828_v24, %v6792_v45 }
0x1ad6   :  { %2817 = vrot.lane.b32.xlu0 %v6953_v18, %s6519_s5  ;;  %v7079_v18 = vpop.permute.xlu1 %208 }
0x1ad7   :  { %v3741_v28 = vadd.f32 %v3737_v6, %v7079_v18 }
0x1ada   :  { %3238 = vrot.lane.b32.xlu0 %v7001_v2, %s6519_s5  ;;  %v6250_v2 = vpop.permute.xlu1 %6249 }
0x1adb   :  { %v6252_v33 = vunpack.i.h.bf16 %v6250_v2  ;;  %v6251_v36 = vunpack.i.l.bf16 %v6250_v2  ;;  %v113_v2 = vld [vmem:[#allocation10 + $0xa0] sm:$0xff] }
0x1add   :  { %v3911_v46 = vsel %vm3907_vm3, %v6251_v36, %v6252_v33 }
0x1ade   :  { %3659 = vrot.lane.b32.xlu0 %v5984_v50, %s6519_s5  ;;  %v7081_v27 = vpop.permute.xlu1 %6259 }
0x1adf   :  { %v6261_v37 = vunpack.i.l.bf16 %v7081_v27  ;;  %v6262_v45 = vunpack.i.h.bf16 %v7081_v27 }
0x1ae1   :  { %v3910_v44 = vsel %vm3907_vm3, %v6261_v37, %v6251_v36 }
0x1ae2   :  { %3948 = vrot.lane.b32.xlu0 %v3843_v5, %s6519_s5  ;;  %v6270_v40 = vpop.permute.xlu1 %6269 }
0x1ae3   :  { %v6272_v6 = vunpack.i.h.bf16 %v6270_v40  ;;  %v6271_v48 = vunpack.i.l.bf16 %v6270_v40 }
0x1ae5   :  { %v3923_v59 = vsel %vm3907_vm3, %v6271_v48, %v6272_v6 }
0x1ae6   :  { %6284 = vrot.lane.b32.xlu0 %v6283_v42, %s6519_s5 }
0x1aea   :  { %6294 = vrot.lane.b32.xlu0 %v6293_v34, %s6519_s5 }
0x1b20   :  { %v3819_v29 = vpop.permute.xlu0 %3818 }
0x1b21   :  { %v3821_v15 = vadd.f32 %v3819_v29, %v3741_v28 }
0x1b23   :  { %v3822_v41 = vmax.f32 %v3821_v15, 0.0 }
0x1b24   :  { %v6255_v24 = vpop.permute.xlu0 %6254 }
0x1b25   :  { %v6257_v47 = vunpack.i.h.bf16 %v6255_v24  ;;  %v6256_v3 = vunpack.i.l.bf16 %v6255_v24  ;;  %3845 = vrot.lane.b32.xlu1 %v3822_v41, %s6530_s6 }
0x1b27   :  { %v3914_v49 = vsel %vm3907_vm3, %v6262_v45, %v6256_v3  ;;  %v3915_v50 = vsel %vm3907_vm3, %v6256_v3, %v6257_v47 }
0x1b28   :  { %v6265_v52 = vpop.permute.xlu0 %6264  ;;  %v6153_v53 = vpack.c.bf16 %v3914_v49, %v3910_v44  ;;  %v6151_v56 = vpack.c.bf16 %v3915_v50, %v3911_v46  ;;  %v211_v44 = vadd.f32 %v7079_v18, %v6669_v10 }
0x1b29   :  { %v6267_v57 = vunpack.i.h.bf16 %v6265_v52  ;;  %v6266_v58 = vunpack.i.l.bf16 %v6265_v52  ;;  %625 = vrot.lane.b32.xlu1 %v6731_v55, %s6519_s5 }
0x1b2a   :  { %6152 = vmatprep.subr.bf16.mxu1 %v6151_v56 }
0x1b2b   :  { %6154 = vmatpush1.bf16.msra.mxu1 %v6153_v53  ;;  %v3919_v60 = vsel %vm3907_vm3, %v6266_v58, %v6267_v57  ;;  %v1981_v53 = vadd.f32 %v6851_v39, %v7079_v18 }
0x1b2c   :  { %v7099_v61 = vpop.permute.xlu0 %6274  ;;  %v6155_v62 = vpack.c.bf16 %v3923_v59, %v3919_v60 }
0x1b2d   :  { %v6277_v63 = vunpack.i.h.bf16 %v7099_v61  ;;  %v6276_v0 = vunpack.i.l.bf16 %v7099_v61  ;;  %1046 = vrot.lane.b32.xlu1 %v6775_v32, %s6519_s5 }
0x1b2e   :  { %6156 = vmatprep.subr.bf16.mxu1 %v6155_v62 }
0x1b2f   :  { %v3918_v55 = vsel %vm3907_vm3, %v6276_v0, %v6266_v58  ;;  %v3922_v1 = vsel %vm3907_vm3, %v6277_v63, %v6271_v48 }
0x1b30   :  { %v628_v11 = vpop.permute.xlu0 %627  ;;  %v6157_v12 = vpack.c.bf16 %v3922_v1, %v3918_v55 }
0x1b31   :  { %1467 = vrot.lane.b32.xlu1 %v6821_v7, %s6519_s5  ;;  %v212_v7 = vadd.f32 %v6667_v9, %v7079_v18  ;;  %v107_v9 = vld [vmem:[#allocation10 + $0x70] sm:$0xff] }
0x1b32   :  { %6158 = vmatpush1.bf16.msra.mxu1 %v6157_v12  ;;  %v6288_v33 = vpack.i.bf16 %v113_v2, %v107_v9 }
0x1b33   :  { %6163 = vmatprep.subr.bf16.mxu1 %v6529_v26  ;;  %v632_v21 = vadd.f32 %v628_v11, %v212_v7 }
0x1b34   :  { %v1049_v32 = vpop.permute.xlu0 %1048 }
0x1b35   :  { %1888 = vrot.lane.b32.xlu1 %v6869_v43, %s6519_s5  ;;  %v1982_v43 = vadd.f32 %v6847_v38, %v7079_v18 }
0x1b38   :  { %v1470_v16 = vpop.permute.xlu0 %1469 }
0x1b39   :  { %3946 = vrot.lane.b32.xlu1 %v3839_v14, %s6519_s5 }
0x1b3c   :  { %v1891_v30 = vpop.permute.xlu0 %1890 }
0x1b3d   :  { %2394 = vrot.lane.b32.xlu1 %v6913_v35, %s6519_s5  ;;  %v1053_v35 = vadd.f32 %v1049_v32, %v632_v21 }
0x1b3f   :  { %v1474_v42 = vadd.f32 %v1470_v16, %v1053_v35 }
0x1b40   :  { %v7121_v17 = vpop.permute.xlu0 %3944 }
0x1b41   :  { %2815 = vrot.lane.b32.xlu1 %v6955_v19, %s6519_s5  ;;  %v6278_v19 = vpack.i.bf16 %v101_v31, %v95_v54  ;;  %v1895_v28 = vadd.f32 %v1891_v30, %v1474_v42 }
0x1b43   :  { %v1897_v36 = vmax.f32 %v1895_v28, 0.0 }
0x1b44   :  { %v2397_v20 = vpop.permute.xlu0 %2396 }
0x1b45   :  { %v2401_v23 = vadd.f32 %v2397_v20, %v1982_v43  ;;  %3236 = vrot.lane.b32.xlu1 %v7003_v4, %s6519_s5  ;;  %v6298_v40 = vpack.i.bf16 %v1897_v36, %v6517_v8 }
0x1b48   :  { %v2818_v5 = vpop.permute.xlu0 %2817 }
0x1b49   :  { %v2822_v34 = vadd.f32 %v2818_v5, %v2401_v23  ;;  %3657 = vrot.lane.b32.xlu1 %v7036_v51, %s6519_s5 }
0x1b4c   :  { %v3239_v38 = vpop.permute.xlu0 %3238 }
0x1b4d   :  { %v3243_v29 = vadd.f32 %v3239_v38, %v2822_v34  ;;  %6279 = vrot.lane.b32.xlu1 %v6278_v19, %s6519_s5 }
0x1b50   :  { %v3660_v4 = vpop.permute.xlu0 %3659 }
0x1b51   :  { %v7134_v15 = vadd.f32 %v3660_v4, %v3243_v29  ;;  %6289 = vrot.lane.b32.xlu1 %v6288_v33, %s6519_s5 }
0x1b54   :  { %v3949_v58 = vpop.permute.xlu0 %3948 }
0x1b55   :  { %6299 = vrot.lane.b32.xlu1 %v6298_v40, %s6530_s6 }
0x1b58   :  { %v6285_v55 = vpop.permute.xlu0 %6284 }
0x1b59   :  { %v6287_v12 = vunpack.i.h.bf16 %v6285_v55  ;;  %v6286_v13 = vunpack.i.l.bf16 %v6285_v55 }
0x1b5c   :  { %v6295_v32 = vpop.permute.xlu0 %6294 }
0x1b5d   :  { %v6297_v7 = vunpack.i.h.bf16 %v6295_v32  ;;  %v6296_v43 = vunpack.i.l.bf16 %v6295_v32 }
0x1b97   :  { %v3846_v51 = vpop.permute.xlu1 %3845 }
0x1b98   :  { %5560 = vmatmul.mubr.msk.f32.vlgmr.msra.gmra.mrb[46].mxu1 %vm121_vm0, %v3846_v51 }
0x1b99   :  { %6018 = vmatprep.mubr.msk.f32.mxu1 %vm6518_vm1, %v6517_v8 }
0x1b9b   :  { %v626_v41 = vpop.permute.xlu1 %625 }
0x1b9c   :  { %v631_v46 = vadd.f32 %v626_v41, %v211_v44 }
0x1b9f   :  { %v1047_v24 = vpop.permute.xlu1 %1046 }
0x1ba0   :  { %v1052_v3 = vadd.f32 %v1047_v24, %v631_v46 }
0x1ba3   :  { %v1468_v47 = vpop.permute.xlu1 %1467 }
0x1ba4   :  { %v1473_v6 = vadd.f32 %v1468_v47, %v1052_v3  ;;  %v3826_v47 = vsub.s32 0, %v7049_v22 }
0x1ba7   :  { %v1889_v48 = vpop.permute.xlu1 %1888 }
0x1ba8   :  { %v1894_v49 = vadd.f32 %v1889_v48, %v1473_v6 }
0x1baa   :  { %v1896_v50 = vmax.f32 %v1894_v49, 0.0 }
0x1bab   :  { %v3947_v52 = vpop.permute.xlu1 %3946 }
0x1bac   :  { %4129 = vrot.lane.b32.xlu0 %v1896_v50, %s6530_s6  ;;  %v3952_v40 = vsel %vm3907_vm3, %v7121_v17, %v3947_v52  ;;  %v3953_v24 = vsel %vm3907_vm3, %v3947_v52, %v3949_v58 }
0x1baf   :  { %v2395_v56 = vpop.permute.xlu1 %2394 }
0x1bb0   :  { %v2400_v57 = vadd.f32 %v2395_v56, %v1981_v53  ;;  %v3666_v53 = vmax.f32 %v7134_v15, 0.0 }
0x1bb3   :  { %v2816_v59 = vpop.permute.xlu1 %2815 }
0x1bb4   :  { %v2821_v60 = vadd.f32 %v2816_v59, %v2400_v57 }
0x1bb7   :  { %v3237_v62 = vpop.permute.xlu1 %3236 }
0x1bb8   :  { %v3242_v10 = vadd.f32 %v3237_v62, %v2821_v60 }
0x1bbb   :  { %v3658_v1 = vpop.permute.xlu1 %3657 }
0x1bbc   :  { %v7147_v11 = vadd.f32 %v3658_v1, %v3242_v10  ;;  %v3830_v10 = vsub.s32 1, %v7049_v22  ;;  %v3827_v1 = vrot.slane %v7057_v25, %v3826_v47 }
0x1bbe   :  { %v3665_v57 = vmax.f32 %v7147_v11, 0.0  ;;  %v3831_v55 = vrot.slane %v7057_v25, %v3830_v10 }
0x1bbf   :  { %v6280_v14 = vpop.permute.xlu1 %6279 }
0x1bc0   :  { %v6282_v16 = vunpack.i.h.bf16 %v6280_v14  ;;  %v6281_v30 = vunpack.i.l.bf16 %v6280_v14 }
0x1bc2   :  { %v3912_v39 = vsel %vm3907_vm3, %v6287_v12, %v6282_v16  ;;  %v3908_v18 = vsel %vm3907_vm3, %v6286_v13, %v6281_v30  ;;  %v3909_v20 = vsel %vm3907_vm3, %v6281_v30, %v6261_v37  ;;  %v3913_v21 = vsel %vm3907_vm3, %v6282_v16, %v6262_v45 }
0x1bc3   :  { %v6145_v23 = vpack.c.bf16 %v3912_v39, %v3908_v18  ;;  %v6290_v54 = vpop.permute.xlu1 %6289  ;;  %v6143_v31 = vpack.c.bf16 %v3913_v21, %v3909_v20 }
0x1bc4   :  { %v6292_v35 = vunpack.i.h.bf16 %v6290_v54  ;;  %v6291_v5 = vunpack.i.l.bf16 %v6290_v54  ;;  %v4103_v54 = vld [vmem:[#allocation8 + $0x8] sm:$0xff] }
0x1bc5   :  { %6144 = vmatprep.subr.bf16.mxu0 %v6143_v31  ;;  %v4102_v31 = vld [vmem:[#allocation8] sm:$0xff] }
0x1bc6   :  { %v3920_v42 = vsel %vm3907_vm3, %v6297_v7, %v6292_v35  ;;  %v3916_v34 = vsel %vm3907_vm3, %v6296_v43, %v6291_v5  ;;  %6146 = vmatpush1.bf16.msra.mxu0 %v6145_v23  ;;  %v3917_v19 = vsel %vm3907_vm3, %v6291_v5, %v6276_v0  ;;  %v3921_v27 = vsel %vm3907_vm3, %v6292_v35, %v6277_v63 }
0x1bc7   :  { %v6149_v37 = vpack.c.bf16 %v3920_v42, %v3916_v34  ;;  %v6300_v45 = vpop.permute.xlu1 %6299  ;;  %v6147_v9 = vpack.c.bf16 %v3921_v27, %v3917_v19  ;;  %v6531_v0 = vmov 1966171168  }
0x1bc8   :  { %v6302_v2 = vunpack.i.h.bf16 %v6300_v45  ;;  %v7165_v28 = vunpack.i.l.bf16 %v6300_v45  ;;  %v4106_v33 = vunpack.c.l.s4 %v6531_v0 }
0x1bc9   :  { %6148 = vmatprep.subr.bf16.mxu0 %v6147_v9 }
0x1bca   :  { %v7174_v29 = vpack.c.bf16 %v7165_v28, %v6302_v2  ;;  %6150 = vmatpush1.bf16.msra.mxu0 %v6149_v37  ;;  %v4107_v36 = vunpack.c.0.s8 %v4106_v33 }
0x1bcb   :  { %6159 = vmatprep.subr.bf16.mxu0 %v6529_v26 }
0x1bcc   :  { %6166 = vmatpush3.bf16.xpose.msk.msra.mxu1 %vm7169_vm4, %v7174_v29  ;;  %v4110_v4 = vsub.s32 %v4107_v36, %v7049_v22 }
0x1bcd   :  { %5559 = vmatmul.mubr.msk.f32.vlgmr.msra.gmra.mrb[42].mxu0 %vm121_vm0, %v3846_v51  ;;  %6171 = vmatprep.subr.bf16.mxu1 %v6529_v26 }
0x1bce   :  { %6011 = vmatprep.mubr.msk.f32.mxu0 %vm6518_vm1, %v6517_v8 }
0x1c1e   :  { %v4130_v61 = vpop.permute.xlu0 %4129 }
0x1c1f   :  { %v6160_v63 = vpack.c.bf16 %v7165_v28, %v4130_v61 }
0x1c21   :  { %6162 = vmatpush3.bf16.xpose.msk.msra.mxu0 %vm7169_vm4, %v6160_v63 }
0x1c22   :  { %6167 = vmatprep.subr.bf16.mxu0 %v6529_v26 }
0x1c6b   :  { %v4097_v51 = vpop.f32.mrb[46].mxu1 }
0x1c6c   :  { %v4098_v41 = vadd.f32 %v4097_v51, %v3952_v40  ;;  %v4099_v44 = vpop.f32.mrb[47].mxu1 }
0x1c6d   :  { %v4100_v46 = vadd.f32 %v4099_v44, %v3953_v24 }
0x1c6e   :  { %v4111_v3 = vrot.slane %v4098_v41, %v4110_v4 }
0x1c6f   :  { %v4755_v56 = vrot.slane %v4100_v46, %v4110_v4 }
0x1c70   :  { %v4112_v6 = vcombine.high %v4111_v3, %v4111_v3  ;;  %v4119_v48 = vrot.slane %v4111_v3, %v4110_v4 }
0x1c71   :  { %v4756_v58 = vcombine.high %v4755_v56, %v4755_v56  ;;  %v4763_v59 = vrot.slane %v4755_v56, %v4110_v4 }
0x1c72   :  { %v4126_v49 = vrot.slane %v4112_v6, %v4110_v4  ;;  %v4289_v50 = vrot.slane %v4119_v48, %v3826_v47  ;;  %6012 = vmatmul.mubr.msk.f32.vlgmr.msra.gmra.mrb[44].mxu0 %vm121_vm0, %v4119_v48 }
0x1c73   :  { %6170 = vmatpush3.bf16.xpose.msk.msra.mxu0 %vm7169_vm4, %v6160_v63  ;;  %6025 = vmatprep.mubr.msk.f32.mxu0 %vm6518_vm1, %v6517_v8  ;;  %v4770_v60 = vrot.slane %v4756_v58, %v4110_v4  ;;  %v4918_v62 = vrot.slane %v4763_v59, %v3826_v47 }
0x1c74   :  { %4290 = vrot.lane.b32.xlu0 %v4289_v50, %s6519_s5  ;;  %6019 = vmatmul.mubr.msk.f32.vlgmr.msra.gmra.mrb[48].mxu1 %vm121_vm0, %v4126_v49  ;;  %v4367_v52 = vrot.slane %v4126_v49, %v3826_v47 }
0x1c75   :  { %6174 = vmatpush3.bf16.xpose.msk.msra.mxu1 %vm7169_vm4, %v7174_v29  ;;  %6175 = vmatprep.subr.bf16.mxu0 %v6529_v26  ;;  %v4996_v15 = vrot.slane %v4770_v60, %v3826_v47 }
0x1c76   :  { %4368 = vrot.lane.b32.xlu1 %v4367_v52, %s6519_s5  ;;  %6032 = vmatprep.mubr.msk.f32.mxu1 %vm6518_vm1, %v6517_v8 }
0x1c77   :  { %6179 = vmatprep.subr.bf16.mxu1 %v6529_v26 }
0x1c78   :  { %4516 = vrot.lane.b32.xlu0 %v4367_v52, %s6520_s15 }
0x1c7a   :  { %4672 = vrot.lane.b32.xlu1 %v3666_v53, %s6530_s6 }
0x1c7c   :  { %4442 = vrot.lane.b32.xlu0 %v4289_v50, %s6520_s15 }
0x1c7e   :  { %4593 = vrot.lane.b32.xlu1 %v3665_v57, %s6530_s6 }
0x1c80   :  { %4590 = vrot.lane.b32.xlu0 %v4289_v50, %s6530_s6 }
0x1c82   :  { %4669 = vrot.lane.b32.xlu1 %v4367_v52, %s6530_s6 }
0x1c84   :  { %4919 = vrot.lane.b32.xlu0 %v4918_v62, %s6519_s5 }
0x1c86   :  { %4997 = vrot.lane.b32.xlu1 %v4996_v15, %s6519_s5 }
0x1c88   :  { %5071 = vrot.lane.b32.xlu0 %v4918_v62, %s6520_s15 }
0x1c8a   :  { %5145 = vrot.lane.b32.xlu1 %v4996_v15, %s6520_s15 }
0x1c8c   :  { %5219 = vrot.lane.b32.xlu0 %v4918_v62, %s6530_s6 }
0x1c8e   :  { %5296 = vrot.lane.b32.xlu1 %v4996_v15, %s6530_s6 }
0x1c92   :  { %3942 = vrot.lane.b32.xlu1 %v3831_v55, %s6519_s5 }
0x1c96   :  { %3940 = vrot.lane.b32.xlu1 %v3827_v1, %s6519_s5 }
0x1ca0   :  { %v7227_v11 = vpop.f32.mrb[42].mxu0 }
0x1ca1   :  { %v7229_v12 = vpop.f32.mrb[43].mxu0 }
0x1ce6   :  { %v4291_v13 = vpop.permute.xlu0 %4290 }
0x1ce7   :  { %6026 = vmatmul.mubr.msk.f32.vlgmr.msra.gmra.mrb[46].mxu0 %vm121_vm0, %v4291_v13 }
0x1ce8   :  { %6178 = vmatpush3.bf16.xpose.msk.msra.mxu0 %vm7169_vm4, %v6160_v63  ;;  %v4369_v32 = vpop.permute.xlu1 %4368  ;;  %6039 = vmatprep.mubr.msk.f32.mxu0 %vm6518_vm1, %v6517_v8 }
0x1ce9   :  { %6033 = vmatmul.mubr.msk.f32.vlgmr.msra.gmra.mrb[50].mxu1 %vm121_vm0, %v4369_v32  ;;  %6183 = vmatprep.subr.bf16.mxu0 %v6529_v26 }
0x1cea   :  { %6182 = vmatpush3.bf16.xpose.msk.msra.mxu1 %vm7169_vm4, %v7174_v29  ;;  %v4517_v25 = vpop.permute.xlu0 %4516  ;;  %6046 = vmatprep.mubr.msk.f32.mxu1 %vm6518_vm1, %v6517_v8 }
0x1ceb   :  { %6187 = vmatprep.subr.bf16.mxu1 %v6529_v26 }
0x1cec   :  { %v4673_v14 = vpop.permute.xlu1 %4672 }
0x1ced   :  { %v6188_v30 = vpack.c.bf16 %v7165_v28, %v4673_v14 }
0x1cee   :  { %v4443_v16 = vpop.permute.xlu0 %4442 }
0x1cef   :  { %6040 = vmatmul.mubr.msk.f32.vlgmr.msra.gmra.mrb[48].mxu0 %vm121_vm0, %v4443_v16 }
0x1cf0   :  { %v4594_v7 = vpop.permute.xlu1 %4593  ;;  %6053 = vmatprep.mubr.msk.f32.mxu0 %vm6518_vm1, %v6517_v8 }
0x1cf1   :  { %v6184_v43 = vpack.c.bf16 %v7165_v28, %v4594_v7  ;;  %6047 = vmatmul.mubr.msk.f32.vlgmr.msra.gmra.mrb[52].mxu1 %vm121_vm0, %v4517_v25 }
0x1cf2   :  { %6190 = vmatpush3.bf16.xpose.msk.msra.mxu1 %vm7169_vm4, %v6188_v30  ;;  %6060 = vmatprep.mubr.msk.f32.mxu1 %vm6518_vm1, %v6517_v8  ;;  %v4591_v18 = vpop.permute.xlu0 %4590 }
0x1cf3   :  { %6186 = vmatpush3.bf16.xpose.msk.msra.mxu0 %vm7169_vm4, %v6184_v43  ;;  %6195 = vmatprep.subr.bf16.mxu1 %v6529_v26 }
0x1cf4   :  { %6191 = vmatprep.subr.bf16.mxu0 %v6529_v26  ;;  %v4670_v39 = vpop.permute.xlu1 %4669 }
0x1cf6   :  { %v4920_v21 = vpop.permute.xlu0 %4919 }
0x1cf8   :  { %v4998_v20 = vpop.permute.xlu1 %4997 }
0x1cf9   :  { %6061 = vmatmul.mubr.msk.f32.vlgmr.msra.gmra.mrb[54].mxu1 %vm121_vm0, %v4670_v39 }
0x1cfa   :  { %6198 = vmatpush3.bf16.xpose.msk.msra.mxu1 %vm7169_vm4, %v6188_v30  ;;  %6054 = vmatmul.mubr.msk.f32.vlgmr.msra.gmra.mrb[50].mxu0 %vm121_vm0, %v4591_v18  ;;  %v5072_v23 = vpop.permute.xlu0 %5071 }
0x1cfb   :  { %6194 = vmatpush3.bf16.xpose.msk.msra.mxu0 %vm7169_vm4, %v6184_v43  ;;  %6074 = vmatprep.mubr.msk.f32.mxu1 %vm6518_vm1, %v6517_v8 }
0x1cfc   :  { %6203 = vmatprep.subr.bf16.mxu1 %v6529_v26  ;;  %6067 = vmatprep.mubr.msk.f32.mxu0 %vm6518_vm1, %v6517_v8 }
0x1cfd   :  { %6199 = vmatprep.subr.bf16.mxu0 %v6529_v26 }
0x1cfe   :  { %v5220_v5 = vpop.permute.xlu0 %5219 }
0x1d01   :  { %6075 = vmatmul.mubr.msk.f32.vlgmr.msra.gmra.mrb[56].mxu1 %vm121_vm0, %v4770_v60 }
0x1d02   :  { %6206 = vmatpush3.bf16.xpose.msk.msra.mxu1 %vm7169_vm4, %v6188_v30  ;;  %6068 = vmatmul.mubr.msk.f32.vlgmr.msra.gmra.mrb[52].mxu0 %vm121_vm0, %v4763_v59 }
0x1d03   :  { %6202 = vmatpush3.bf16.xpose.msk.msra.mxu0 %vm7169_vm4, %v6184_v43  ;;  %6088 = vmatprep.mubr.msk.f32.mxu1 %vm6518_vm1, %v6517_v8 }
0x1d04   :  { %6211 = vmatprep.subr.bf16.mxu1 %v6529_v26  ;;  %6081 = vmatprep.mubr.msk.f32.mxu0 %vm6518_vm1, %v6517_v8 }
0x1d05   :  { %6207 = vmatprep.subr.bf16.mxu0 %v6529_v26  ;;  %v5146_v26 = vpop.permute.xlu1 %5145 }
0x1d09   :  { %6089 = vmatmul.mubr.msk.f32.vlgmr.msra.gmra.mrb[58].mxu1 %vm121_vm0, %v4998_v20  ;;  %v5297_v35 = vpop.permute.xlu1 %5296 }
0x1d0a   :  { %6214 = vmatpush3.bf16.xpose.msk.msra.mxu1 %vm7169_vm4, %v6188_v30  ;;  %6082 = vmatmul.mubr.msk.f32.vlgmr.msra.gmra.mrb[54].mxu0 %vm121_vm0, %v4920_v21 }
0x1d0b   :  { %6210 = vmatpush3.bf16.xpose.msk.msra.mxu0 %vm7169_vm4, %v6184_v43  ;;  %6102 = vmatprep.mubr.msk.f32.mxu1 %vm6518_vm1, %v6517_v8 }
0x1d0c   :  { %6110 = vmatprep.subr.mxu1 %v6517_v8  ;;  %6095 = vmatprep.mubr.msk.f32.mxu0 %vm6518_vm1, %v6517_v8 }
0x1d0d   :  { %6105 = vmatprep.subr.mxu0 %v6517_v8  ;;  %v3943_v7 = vpop.permute.xlu1 %3942 }
0x1d0e   :  { %v3951_v18 = vsel %vm3907_vm3, %v3943_v7, %v7121_v17 }
0x1d11   :  { %6103 = vmatmul.mubr.msk.f32.vlgmr.msra.gmra.mrb[60].mxu1 %vm121_vm0, %v5146_v26  ;;  %v3941_v39 = vpop.permute.xlu1 %3940  ;;  %v4029_v26 = vadd.f32 %v7229_v12, %v3951_v18  ;;  %v6539_v12 = vmov 1983009808  }
0x1d12   :  { %6111 = vmatpush3.xpose.msk.msra.mxu1 %vm121_vm0, %v4103_v54  ;;  %6096 = vmatmul.mubr.msk.f32.vlgmr.msra.gmra.mrb[56].mxu0 %vm121_vm0, %v5072_v23 }
0x1d13   :  { %6106 = vmatpush3.xpose.msk.msra.mxu0 %vm121_vm0, %v4102_v31  ;;  %6112 = vmatprep.mubr.msk.f32.mxu1 %vm6518_vm1, %v6517_v8  ;;  %v3950_v31 = vsel %vm3907_vm3, %v3941_v39, %v3943_v7 }
0x1d14   :  { %6107 = vmatprep.mubr.msk.f32.mxu0 %vm6518_vm1, %v6517_v8  ;;  %v4027_v17 = vadd.f32 %v7227_v11, %v3950_v31  ;;  %v5447_v11 = vld [vmem:[%s7339_s4] sm:$0x3f] }
0x1d15   :  { %6113 = vmatmul.mubr.msk.f32.vlgmr.msra.gmra.mrb[62].mxu1 %vm121_vm0, %v5297_v35  ;;  %vm5448_vm14 = vcmp.eq.s32.totalorder %v5447_v11, 0 }
0x1d16   :  { %6108 = vmatmul.mubr.msk.f32.vlgmr.msra.gmra.mrb[58].mxu0 %vm121_vm0, %v5220_v5 }
0x1d45   :  { %v4205_v42 = vpop.f32.mrb[44].mxu0 }
0x1d46   :  { %v6013_v34 = vpop.f32.mrb[45].mxu0 }
0x1d47   :  { %v4282_v19 = vpop.f32.mrb[48].mxu1 }
0x1d48   :  { %v5375_v27 = vrot.slane %v4282_v19, 7  ;;  %v6020_v37 = vpop.f32.mrb[49].mxu1 }
0x1d4a   :  { %v5377_v45 = vsel %vm5376_vm5, %v5375_v27, %v4205_v42 }
0x1d4b   :  { %5378 = vrot.lane.b32.xlu0 %v5377_v45, %s6532_s18 }
0x1dba   :  { %v4360_v9 = vpop.f32.mrb[46].mxu0 }
0x1dbb   :  { %v6027_v2 = vpop.f32.mrb[47].mxu0 }
0x1dbc   :  { %v4438_v28 = vpop.f32.mrb[50].mxu1 }
0x1dbd   :  { %v5383_v38 = vrot.slane %v4438_v28, 7  ;;  %v6034_v8 = vpop.f32.mrb[51].mxu1  ;;  %v5379_v43 = vpop.permute.xlu0 %5378 }
0x1dbe   :  { %v5431_v23 = vsel %vm5430_vm6, %v4029_v26, %v5379_v43 }
0x1dbf   :  { %v5384_v29 = vsel %vm5376_vm5, %v5383_v38, %v4360_v9  ;;  %v5454_v9 = vunpack.c.l.s4 %v6539_v12 }
0x1dc0   :  { %5385 = vrot.lane.b32.xlu1 %v5384_v29, %s6533_s27 }
0x1dc1   :  { %v5455_v2 = vunpack.c.0.s8 %v5454_v9 }
0x1dc2   :  { %v4512_v61 = vpop.f32.mrb[48].mxu0 }
0x1dc3   :  { %v6041_v63 = vpop.f32.mrb[49].mxu0  ;;  %v5458_v38 = vsub.s32 %v5455_v2, %v7049_v22 }
0x1dc4   :  { %v4586_v0 = vpop.f32.mrb[52].mxu1 }
0x1dc5   :  { %v5390_v33 = vrot.slane %v4586_v0, 7  ;;  %v6048_v36 = vpop.f32.mrb[53].mxu1 }
0x1dc7   :  { %v5391_v4 = vsel %vm5376_vm5, %v5390_v33, %v4512_v61 }
0x1dc8   :  { %5392 = vrot.lane.b32.xlu0 %v5391_v4, %s6519_s5 }
0x1dcc   :  { %v4744_v40 = vpop.f32.mrb[54].mxu1 }
0x1dcd   :  { %v5397_v51 = vrot.slane %v4744_v40, 7  ;;  %v6062_v41 = vpop.f32.mrb[55].mxu1  ;;  %v4665_v24 = vpop.f32.mrb[50].mxu0 }
0x1dce   :  { %v6055_v44 = vpop.f32.mrb[51].mxu0 }
0x1dcf   :  { %v5398_v46 = vsel %vm5376_vm5, %v5397_v51, %v4665_v24 }
0x1dd0   :  { %5399 = vrot.lane.b32.xlu0 %v5398_v46, %s6534_s28 }
0x1dd4   :  { %v4911_v47 = vpop.f32.mrb[56].mxu1 }
0x1dd5   :  { %v5404_v3 = vrot.slane %v4911_v47, 7  ;;  %v6076_v6 = vpop.f32.mrb[57].mxu1  ;;  %v4839_v48 = vpop.f32.mrb[52].mxu0 }
0x1dd6   :  { %v6069_v49 = vpop.f32.mrb[53].mxu0 }
0x1dd7   :  { %v5405_v50 = vsel %vm5376_vm5, %v5404_v3, %v4839_v48 }
0x1dd8   :  { %5406 = vrot.lane.b32.xlu1 %v5405_v50, %s6535_s29 }
0x1ddc   :  { %v5067_v52 = vpop.f32.mrb[58].mxu1 }
0x1ddd   :  { %v5411_v53 = vrot.slane %v5067_v52, 7  ;;  %v6090_v56 = vpop.f32.mrb[59].mxu1  ;;  %v4989_v57 = vpop.f32.mrb[54].mxu0 }
0x1dde   :  { %v6083_v58 = vpop.f32.mrb[55].mxu0 }
0x1ddf   :  { %v5412_v59 = vsel %vm5376_vm5, %v5411_v53, %v4989_v57 }
0x1de0   :  { %5413 = vrot.lane.b32.xlu0 %v5412_v59, %s6536_s30 }
0x1de4   :  { %v5215_v60 = vpop.f32.mrb[60].mxu1 }
0x1de5   :  { %v5418_v62 = vrot.slane %v5215_v60, 7  ;;  %v6104_v15 = vpop.f32.mrb[61].mxu1  ;;  %v5141_v10 = vpop.f32.mrb[56].mxu0 }
0x1de6   :  { %v6097_v55 = vpop.f32.mrb[57].mxu0 }
0x1de7   :  { %v5419_v1 = vsel %vm5376_vm5, %v5418_v62, %v5141_v10 }
0x1de8   :  { %5420 = vrot.lane.b32.xlu1 %v5419_v1, %s6537_s8  ;;  %v5369_v13 = vpop.f32.mrb[62].mxu1 }
0x1de9   :  { %v5425_v32 = vrot.slane %v5369_v13, 7  ;;  %v6114_v25 = vpop.f32.mrb[63].mxu1  ;;  %v5292_v14 = vpop.f32.mrb[58].mxu0 }
0x1dea   :  { %v6109_v16 = vpop.f32.mrb[59].mxu0 }
0x1deb   :  { %v5426_v30 = vsel %vm5376_vm5, %v5425_v32, %v5292_v14 }
0x1dec   :  { %5427 = vrot.lane.b32.xlu0 %v5426_v30, %s6538_s9 }
0x1e32   :  { %v5386_v21 = vpop.permute.xlu1 %5385 }
0x1e33   :  { %v5433_v35 = vsel %vm5432_vm7, %v5431_v23, %v5386_v21 }
0x1e3a   :  { %v5393_v20 = vpop.permute.xlu0 %5392 }
0x1e3b   :  { %v5434_v42 = vsel %vm3907_vm3, %v5433_v35, %v5393_v20 }
0x1e42   :  { %v5400_v54 = vpop.permute.xlu0 %5399 }
0x1e43   :  { %v5436_v34 = vsel %vm5435_vm8, %v5434_v42, %v5400_v54 }
0x1e4a   :  { %v5407_v5 = vpop.permute.xlu1 %5406 }
0x1e4b   :  { %v5438_v19 = vsel %vm5437_vm9, %v5436_v34, %v5407_v5 }
0x1e52   :  { %v5414_v27 = vpop.permute.xlu0 %5413 }
0x1e53   :  { %v5440_v37 = vsel %vm5439_vm10, %v5438_v19, %v5414_v27 }
0x1e54   :  { %v5452_v45 = vcombine.low %v4027_v17, %v5440_v37 }
0x1e56   :  { %v5459_v0 = vrot.slane %v5452_v45, %v5458_v38 }
0x1e5a   :  { %v5421_v28 = vpop.permute.xlu1 %5420 }
0x1e5b   :  { %v5442_v8 = vsel %vm5441_vm11, %v5414_v27, %v5421_v28 }
0x1e5e   :  { %v5428_v29 = vpop.permute.xlu0 %5427 }
0x1e5f   :  { %v5444_v61 = vsel %vm5443_vm12, %v5442_v8, %v5428_v29 }
0x1e60   :  { %v5446_v63 = vsel %vm5445_vm13, %v5444_v61, 0.0 }
0x1e61   :  { %v5466_v33 = vrot.slane %v5446_v63, %v5458_v38 }
0x1e63   :  { %v5467_v36 = vcombine.low %v5459_v0, %v5466_v33 }
0x1e65   :  { %v5469_v4 = vsel %vm5448_vm14, -1e+09, %v5467_v36 }
0x1e66   :  { %5470 = vst [vmem:[#allocation11] sm:$0x3f] %v5469_v4 }
0x1e67   :  { %6489 = shalt.err (!%p6486_p2)
}
0x1e68   :  { %s6490_s4 = scalar_lea.hbm %s7342_s7, 96 }
0x1e69   :  { %p6491_p3 = scmp.ne.s32.totalorder %s7342_s7, %s6490_s4  ;;  %p6494_p4 = scmp.lt.u32.totalorder %s6490_s4, %s7342_s7 }
0x1e6b   :  { %p6496_p5 = pnand %p6494_p4, %p6491_p3 }
0x1e6d   :  { %6499 = shalt.err (!%p6496_p5)
}
0x1e6e   :  { %5480 = dma.vmem_to_hbm [thread:$0]  %s5478_s2, 96, %s7342_s7, [#allocation4]  }
0x1e6f   :  { %6506 = dma.done.wait [#allocation4], 96  }
0x1e70   :  { %6507 = vsyncadd [#allocation4], 4294967200 }
0x1e71   :  { %5484 = vsyncpa [#allocation3], 1 }
0x1e72   :  { %5485 = vsyncpa [#allocation6], 1 }
0x1e73   :  { %5486 = vsyncpa [#allocation9], 1 }
0x1e74   :  { %5487 = vsyncpa [#allocation4], 1 }

</bundles_post_ra>
